<compile_context>
chip_gen: v6e
topology: v6e:2x2x1
jax: 0.10.0
libtpu: 0.0.40
codegen_flags: <defaults>
</compile_context>

<pallas_src>
import functools

import jax
import jax.numpy as jnp
from jax import lax
from jax.experimental import pallas as pl
from jax.experimental.pallas import tpu as pltpu


def _fused_kernel(d1_ref, d2_ref, w1_ref, b1_ref, w2_ref, b2_ref, out_ref,
                  fp_ref, *, N, C):
    """Per-batch fused: outer-concat -> pad -> im2col -> 3x3 conv -> ReLU -> 1x1 conv."""
    C2 = 2 * C
    d1 = d1_ref[0].astype(jnp.float32)          # (N, C)
    d2 = d2_ref[0].astype(jnp.float32)          # (N, C)

    # --- outer_concatenation (kept on-chip, never written back to HBM) -----
    # feat[i, j, :] = concat(data1[i, :], data2[j, :])
    feat = jnp.concatenate(
        [jnp.broadcast_to(d1[:, None, :], (N, N, C)),
         jnp.broadcast_to(d2[None, :, :], (N, N, C))], axis=-1)    # (N, N, 2C)

    # --- "same" zero padding for the 3x3 conv, in a VMEM scratch ------------
    fp_ref[...] = jnp.zeros((N + 2, N + 2, C2), jnp.float32)
    fp_ref[1:N + 1, 1:N + 1, :] = feat

    # --- im2col: the 9 shifted windows as one (N*N, 9*2C) patch matrix ------
    slabs = [fp_ref[dh:dh + N, dw:dw + N, :].reshape(N * N, C2)
             for dh in range(3) for dw in range(3)]
    patch = jnp.concatenate(slabs, axis=-1)                        # (N*N, 9*2C)

    # --- conv1 (3x3, 2C -> F): single MXU matmul + bias + ReLU --------------
    h = jnp.dot(patch, w1_ref[...], preferred_element_type=jnp.float32)
    h = jnp.maximum(h + b1_ref[...], 0.0)                          # (N*N, F)

    # --- conv2 (1x1, F -> 1): contract over F, lane-dense (1, N*N) result ---
    o = lax.dot_general(w2_ref[...], h,
                        dimension_numbers=(((1,), (1,)), ((), ())),
                        preferred_element_type=jnp.float32)        # (1, N*N)
    out_ref[0] = (o + b2_ref[0]).astype(out_ref.dtype)


def proposed_model_forward(data1, data2, params):
    """Pallas equivalent of ProposedModel.forward (UNet replaced by stub head)."""
    B, N, C = data1.shape
    C2 = 2 * C
    w1, b1, w2, b2 = params                      # w1: (3,3,2C,F) HWIO
    F = w1.shape[-1]

    # mirrors the PyTorch print (NCHW shape convention); fires at trace time.
    print('formatted_input.shape: ', (B, C2, N, N))

    # im2col column order is ((dh*3+dw)*2C + c), which is exactly the
    # row-major reshape of HWIO weights.
    w1_mat = w1.reshape(9 * C2, F).astype(jnp.float32)
    b1_row = b1.reshape(1, F).astype(jnp.float32)
    w2_row = w2.reshape(1, F).astype(jnp.float32)
    b2_sc = jnp.asarray(b2, jnp.float32).reshape(1)

    kern = functools.partial(_fused_kernel, N=N, C=C)
    out = pl.pallas_call(
        kern,
        out_shape=jax.ShapeDtypeStruct((B, 1, N * N), jnp.float32),
        grid_spec=pltpu.PrefetchScalarGridSpec(
            num_scalar_prefetch=0,
            grid=(B,),
            in_specs=[
                pl.BlockSpec((1, N, C), lambda b: (b, 0, 0)),       # data1
                pl.BlockSpec((1, N, C), lambda b: (b, 0, 0)),       # data2
                pl.BlockSpec((9 * C2, F), lambda b: (0, 0)),        # conv1 W (im2col)
                pl.BlockSpec((1, F), lambda b: (0, 0)),             # conv1 bias
                pl.BlockSpec((1, F), lambda b: (0, 0)),             # conv2 W
                pl.BlockSpec(memory_space=pltpu.MemorySpace.SMEM),  # conv2 bias (scalar)
            ],
            out_specs=pl.BlockSpec((1, 1, N * N), lambda b: (b, 0, 0)),
            scratch_shapes=[pltpu.VMEM((N + 2, N + 2, C2), jnp.float32)],
        ),
        compiler_params=pltpu.CompilerParams(
            dimension_semantics=("parallel",)),
    )(data1, data2, w1_mat, b1_row, w2_row, b2_sc)

    # pred_path (B,1,N,N) -> squeeze(1) -> (B,N,N); flat index p = i*N + j.
    return out.reshape(B, N, N)


if __name__ == "__main__":
    B, N, C, F = 2, 16, 4, 32     # input_ch = C = 4  ->  UNet in_channels = 8

    key = jax.random.PRNGKey(0)
    k1, k2, k3, k4, k5, k6 = jax.random.split(key, 6)
    data1 = jax.random.normal(k1, (B, N, C), jnp.float32)
    data2 = jax.random.normal(k2, (B, N, C), jnp.float32)

    # deterministic synthetic parameters for the stub conv head
    w1 = jax.random.normal(k3, (3, 3, 2 * C, F), jnp.float32) * 0.1   # HWIO
    b1 = jax.random.normal(k4, (F,), jnp.float32) * 0.01
    w2 = jax.random.normal(k5, (F,), jnp.float32) * 0.1
    b2 = jax.random.normal(k6, (), jnp.float32) * 0.01
    params = (w1, b1, w2, b2)

    fwd = jax.jit(proposed_model_forward)
    out = jax.block_until_ready(fwd(data1, data2, params))
    assert out.shape == (B, N, N)

    # --- pure-JAX reference mirroring the PyTorch module (same stub head) ---
    x_rep = jnp.broadcast_to(data1[:, :, None, :], (B, N, N, C))
    y_rep = jnp.broadcast_to(data2[:, None, :, :], (B, N, N, C))
    formatted_nhwc = jnp.concatenate([x_rep, y_rep], axis=-1)   # NHWC of torch NCHW
    h_ref = lax.conv_general_dilated(
        formatted_nhwc, w1, window_strides=(1, 1), padding="SAME",
        dimension_numbers=("NHWC", "HWIO", "NHWC"),
        precision=lax.Precision.HIGHEST)
    h_ref = jnp.maximum(h_ref + b1.reshape(1, 1, 1, F), 0.0)
    ref = jnp.einsum("bijf,f->bij", h_ref, w2,
                     precision=lax.Precision.HIGHEST) + b2

    max_err = float(jnp.max(jnp.abs(out - ref)))
    assert jnp.allclose(out, ref, atol=1e-4, rtol=1e-4), max_err

    print("KERNEL_OK")
</pallas_src>

<mosaic_0001>
module attributes {stable_mosaic.version = 11 : i64} {
  func.func @_fused_kernel(%arg0: i32, %arg1: memref<1x16x4xf32, #tpu.memory_space<vmem>>, %arg2: memref<1x16x4xf32, #tpu.memory_space<vmem>>, %arg3: memref<72x32xf32, #tpu.memory_space<vmem>>, %arg4: memref<1x32xf32, #tpu.memory_space<vmem>>, %arg5: memref<1x32xf32, #tpu.memory_space<vmem>>, %arg6: memref<1xf32, #tpu.memory_space<smem>>, %arg7: memref<1x1x256xf32, #tpu.memory_space<vmem>>, %arg8: memref<18x18x8xf32, #tpu.memory_space<vmem>>) attributes {dimension_semantics = [#tpu.dimension_semantics<parallel>], iteration_bounds = array<i64: 2>, scalar_prefetch = 0 : i64, scratch_operands = 1 : i64, tpu.core_type = #tpu.core_type<tc>, window_params = [{transform_indices = @transform_0, window_bounds = array<i64: 1, 16, 4>}, {transform_indices = @transform_1, window_bounds = array<i64: 1, 16, 4>}, {pipeline_mode = #tpu.pipeline_mode<synchronous>, transform_indices = @transform_2, window_bounds = array<i64: 72, 32>}, {pipeline_mode = #tpu.pipeline_mode<synchronous>, transform_indices = @transform_3, window_bounds = array<i64: 1, 32>}, {pipeline_mode = #tpu.pipeline_mode<synchronous>, transform_indices = @transform_4, window_bounds = array<i64: 1, 32>}, {transform_indices = @transform_5, window_bounds = array<i64: 1>}, {transform_indices = @transform_6, window_bounds = array<i64: 1, 1, 256>}]} {
    %c0 = arith.constant 0 : index
    %c0_0 = arith.constant 0 : index
    %c0_1 = arith.constant 0 : index
    %0 = vector.load %arg1[%c0, %c0_0, %c0_1] : memref<1x16x4xf32, #tpu.memory_space<vmem>>, vector<1x16x4xf32>
    %1 = vector.shape_cast %0 : vector<1x16x4xf32> to vector<16x4xf32>
    %c0_2 = arith.constant 0 : index
    %c0_3 = arith.constant 0 : index
    %c0_4 = arith.constant 0 : index
    %2 = vector.load %arg2[%c0_2, %c0_3, %c0_4] : memref<1x16x4xf32, #tpu.memory_space<vmem>>, vector<1x16x4xf32>
    %3 = vector.shape_cast %2 : vector<1x16x4xf32> to vector<16x4xf32>
    %4 = vector.shape_cast %1 : vector<16x4xf32> to vector<16x1x4xf32>
    %5 = vector.shape_cast %4 : vector<16x1x4xf32> to vector<16x1x4xf32>
    %6 = vector.broadcast %5 : vector<16x1x4xf32> to vector<16x16x4xf32>
    %7 = vector.shape_cast %3 : vector<16x4xf32> to vector<1x16x4xf32>
    %8 = vector.shape_cast %7 : vector<1x16x4xf32> to vector<1x16x4xf32>
    %9 = vector.broadcast %8 : vector<1x16x4xf32> to vector<16x16x4xf32>
    %10 = tpu.concatenate %6, %9 in 2 : vector<16x16x4xf32>, vector<16x16x4xf32> -> vector<16x16x8xf32>
    %cst = arith.constant 0.000000e+00 : f32
    %11 = vector.broadcast %cst : f32 to vector<18x18x8xf32>
    %c0_5 = arith.constant 0 : index
    %c0_6 = arith.constant 0 : index
    %c0_7 = arith.constant 0 : index
    %12 = vector.load %arg8[%c0_5, %c0_6, %c0_7] : memref<18x18x8xf32, #tpu.memory_space<vmem>>, vector<18x18x8xf32>
    tpu.vector_store %arg8[%c0_5, %c0_6, %c0_7], %11 {strides = array<i32>} : memref<18x18x8xf32, #tpu.memory_space<vmem>>, vector<18x18x8xf32>,
    %c1 = arith.constant 1 : index
    %c1_8 = arith.constant 1 : index
    %c0_9 = arith.constant 0 : index
    %13 = vector.load %arg8[%c1, %c1_8, %c0_9] : memref<18x18x8xf32, #tpu.memory_space<vmem>>, vector<16x16x8xf32>
    tpu.vector_store %arg8[%c1, %c1_8, %c0_9], %10 {strides = array<i32>} : memref<18x18x8xf32, #tpu.memory_space<vmem>>, vector<16x16x8xf32>,
    %c0_10 = arith.constant 0 : index
    %c0_11 = arith.constant 0 : index
    %c0_12 = arith.constant 0 : index
    %14 = vector.load %arg8[%c0_10, %c0_11, %c0_12] : memref<18x18x8xf32, #tpu.memory_space<vmem>>, vector<16x16x8xf32>
    %15 = vector.shape_cast %14 : vector<16x16x8xf32> to vector<256x8xf32>
    %c0_13 = arith.constant 0 : index
    %c1_14 = arith.constant 1 : index
    %c0_15 = arith.constant 0 : index
    %16 = vector.load %arg8[%c0_13, %c1_14, %c0_15] : memref<18x18x8xf32, #tpu.memory_space<vmem>>, vector<16x16x8xf32>
    %17 = vector.shape_cast %16 : vector<16x16x8xf32> to vector<256x8xf32>
    %c0_16 = arith.constant 0 : index
    %c2 = arith.constant 2 : index
    %c0_17 = arith.constant 0 : index
    %18 = vector.load %arg8[%c0_16, %c2, %c0_17] : memref<18x18x8xf32, #tpu.memory_space<vmem>>, vector<16x16x8xf32>
    %19 = vector.shape_cast %18 : vector<16x16x8xf32> to vector<256x8xf32>
    %c1_18 = arith.constant 1 : index
    %c0_19 = arith.constant 0 : index
    %c0_20 = arith.constant 0 : index
    %20 = vector.load %arg8[%c1_18, %c0_19, %c0_20] : memref<18x18x8xf32, #tpu.memory_space<vmem>>, vector<16x16x8xf32>
    %21 = vector.shape_cast %20 : vector<16x16x8xf32> to vector<256x8xf32>
    %c1_21 = arith.constant 1 : index
    %c1_22 = arith.constant 1 : index
    %c0_23 = arith.constant 0 : index
    %22 = vector.load %arg8[%c1_21, %c1_22, %c0_23] : memref<18x18x8xf32, #tpu.memory_space<vmem>>, vector<16x16x8xf32>
    %23 = vector.shape_cast %22 : vector<16x16x8xf32> to vector<256x8xf32>
    %c1_24 = arith.constant 1 : index
    %c2_25 = arith.constant 2 : index
    %c0_26 = arith.constant 0 : index
    %24 = vector.load %arg8[%c1_24, %c2_25, %c0_26] : memref<18x18x8xf32, #tpu.memory_space<vmem>>, vector<16x16x8xf32>
    %25 = vector.shape_cast %24 : vector<16x16x8xf32> to vector<256x8xf32>
    %c2_27 = arith.constant 2 : index
    %c0_28 = arith.constant 0 : index
    %c0_29 = arith.constant 0 : index
    %26 = vector.load %arg8[%c2_27, %c0_28, %c0_29] : memref<18x18x8xf32, #tpu.memory_space<vmem>>, vector<16x16x8xf32>
    %27 = vector.shape_cast %26 : vector<16x16x8xf32> to vector<256x8xf32>
    %c2_30 = arith.constant 2 : index
    %c1_31 = arith.constant 1 : index
    %c0_32 = arith.constant 0 : index
    %28 = vector.load %arg8[%c2_30, %c1_31, %c0_32] : memref<18x18x8xf32, #tpu.memory_space<vmem>>, vector<16x16x8xf32>
    %29 = vector.shape_cast %28 : vector<16x16x8xf32> to vector<256x8xf32>
    %c2_33 = arith.constant 2 : index
    %c2_34 = arith.constant 2 : index
    %c0_35 = arith.constant 0 : index
    %30 = vector.load %arg8[%c2_33, %c2_34, %c0_35] : memref<18x18x8xf32, #tpu.memory_space<vmem>>, vector<16x16x8xf32>
    %31 = vector.shape_cast %30 : vector<16x16x8xf32> to vector<256x8xf32>
    %32 = tpu.concatenate %15, %17, %19, %21, %23, %25, %27, %29, %31 in 1 : vector<256x8xf32>, vector<256x8xf32>, vector<256x8xf32>, vector<256x8xf32>, vector<256x8xf32>, vector<256x8xf32>, vector<256x8xf32>, vector<256x8xf32>, vector<256x8xf32> -> vector<256x72xf32>
    %c0_36 = arith.constant 0 : index
    %c0_37 = arith.constant 0 : index
    %33 = vector.load %arg3[%c0_36, %c0_37] : memref<72x32xf32, #tpu.memory_space<vmem>>, vector<72x32xf32>
    %cst_38 = arith.constant dense<0.000000e+00> : vector<256x32xf32>
    %34 = tpu.matmul %32, %33, %cst_38 {dimension_numbers = #tpu.dot_dimension_numbers<[1], [0], [0], [1], [0, 0, 1, 1], [], []>} : vector<256x72xf32>, vector<72x32xf32>, vector<256x32xf32> -> vector<256x32xf32>
    %c0_39 = arith.constant 0 : index
    %c0_40 = arith.constant 0 : index
    %35 = vector.load %arg4[%c0_39, %c0_40] : memref<1x32xf32, #tpu.memory_space<vmem>>, vector<1x32xf32>
    %36 = vector.broadcast %35 : vector<1x32xf32> to vector<256x32xf32>
    %37 = arith.addf %34, %36 : vector<256x32xf32>
    %cst_41 = arith.constant 0.000000e+00 : f32
    %38 = vector.broadcast %cst_41 : f32 to vector<256x32xf32>
    %39 = arith.maximumf %37, %38 : vector<256x32xf32>
    %c0_42 = arith.constant 0 : index
    %c0_43 = arith.constant 0 : index
    %40 = vector.load %arg5[%c0_42, %c0_43] : memref<1x32xf32, #tpu.memory_space<vmem>>, vector<1x32xf32>
    %cst_44 = arith.constant dense<0.000000e+00> : vector<1x256xf32>
    %41 = tpu.matmul %40, %39, %cst_44 {dimension_numbers = #tpu.dot_dimension_numbers<[1], [1], [0], [0], [0, 0, 1, 0], [], []>} : vector<1x32xf32>, vector<256x32xf32>, vector<1x256xf32> -> vector<1x256xf32>
    %c0_45 = arith.constant 0 : index
    %42 = memref.load %arg6[%c0_45] : memref<1xf32, #tpu.memory_space<smem>>
    %43 = vector.broadcast %42 : f32 to vector<1x256xf32>
    %44 = arith.addf %41, %43 : vector<1x256xf32>
    %c0_46 = arith.constant 0 : index
    %c0_47 = arith.constant 0 : index
    %c0_48 = arith.constant 0 : index
    %45 = vector.load %arg7[%c0_46, %c0_47, %c0_48] : memref<1x1x256xf32, #tpu.memory_space<vmem>>, vector<1x1x256xf32>
    %46 = vector.shape_cast %45 : vector<1x1x256xf32> to vector<1x256xf32>
    %47 = vector.shape_cast %44 : vector<1x256xf32> to vector<1x1x256xf32>
    tpu.vector_store %arg7[%c0_46, %c0_47, %c0_48], %47 {strides = array<i32>} : memref<1x1x256xf32, #tpu.memory_space<vmem>>, vector<1x1x256xf32>,
    return
  }
  func.func @transform_0(%arg0: i32) -> (i32, i32, i32) {
    %c0_i32 = arith.constant 0 : i32
    %c0_i32_0 = arith.constant 0 : i32
    %c0_i32_1 = arith.constant 0 : i32
    return %arg0, %c0_i32, %c0_i32_0 : i32, i32, i32
  }
  func.func @transform_1(%arg0: i32) -> (i32, i32, i32) {
    %c0_i32 = arith.constant 0 : i32
    %c0_i32_0 = arith.constant 0 : i32
    %c0_i32_1 = arith.constant 0 : i32
    return %arg0, %c0_i32, %c0_i32_0 : i32, i32, i32
  }
  func.func @transform_2(%arg0: i32) -> (i32, i32) {
    %c0_i32 = arith.constant 0 : i32
    %c0_i32_0 = arith.constant 0 : i32
    %c0_i32_1 = arith.constant 0 : i32
    return %c0_i32, %c0_i32_0 : i32, i32
  }
  func.func @transform_3(%arg0: i32) -> (i32, i32) {
    %c0_i32 = arith.constant 0 : i32
    %c0_i32_0 = arith.constant 0 : i32
    %c0_i32_1 = arith.constant 0 : i32
    return %c0_i32, %c0_i32_0 : i32, i32
  }
  func.func @transform_4(%arg0: i32) -> (i32, i32) {
    %c0_i32 = arith.constant 0 : i32
    %c0_i32_0 = arith.constant 0 : i32
    %c0_i32_1 = arith.constant 0 : i32
    return %c0_i32, %c0_i32_0 : i32, i32
  }
  func.func @transform_5(%arg0: i32) -> i32 {
    %c0_i32 = arith.constant 0 : i32
    %c0_i32_0 = arith.constant 0 : i32
    return %c0_i32 : i32
  }
  func.func @transform_6(%arg0: i32) -> (i32, i32, i32) {
    %c0_i32 = arith.constant 0 : i32
    %c0_i32_0 = arith.constant 0 : i32
    %c0_i32_1 = arith.constant 0 : i32
    return %arg0, %c0_i32, %c0_i32_0 : i32, i32, i32
  }
}

</mosaic_0001>

<bundles_post_ra>
// kernel: proposed_model_forward.1
= control target key start
LH: loop header
LB: loop body
LE: loop exit
PB: predicated region body
PF: predicated region fallthrough
CT: control target
= control target key end

     0   :  { %s3091_s23 = smov 0   ;;  %s4346_s0 = inlined_call_operand.vmem [shape: f32[2,16,4], index: 0, kind: input, shape index: {}]   ;;  %s4347_s1 = inlined_call_operand.vmem [shape: f32[2,16,4], index: 1, kind: input, shape index: {}]   ;;  %s4348_s2 = inlined_call_operand.vmem [shape: f32[72,32], index: 2, kind: input, shape index: {}]   ;;  %s4349_s3 = inlined_call_operand.vmem [shape: f32[1,32], index: 3, kind: input, shape index: {}]   ;;  %s4350_s4 = inlined_call_operand.vmem [shape: f32[1,32], index: 4, kind: input, shape index: {}]   ;;  %s4351_s5 = inlined_call_operand.<no memory space> [shape: f32[1], index: 5, kind: input, shape index: {}]   ;;  %s4352_s6 = inlined_call_operand.vmem [shape: f32[2,1,256], index: 6, kind: output, shape index: {}]  }
   0x1   :  { %11 = sst [smem:[#allocation3]] %s4351_s5 }
   0x2 LB: > { %s2792_s24 = sadd.s32 4294967295, %s3040_s23   ;;  %p2796_p0 = scmp.ge.s32.totalorder %s3040_s23, 1  ;;  %s3040_s23 = sphi %s3091_s23, %s17_s23  }
   0x3   : > { %p223_p1 = scmp.lt.s32.totalorder %s3040_s23, 3 }
   0x5   : > { %p224_p2 = pnand %p2796_p0, %p223_p1 }
   0x6   : > { %p3101_p3 = scmp.lt.s32.totalorder (!%p224_p2), %s2792_s24, 1  ;;  %s3043_s29 = smov (!%p224_p2), 4  }
   0x7   : > { %227 = sbr.rel (%p224_p2) target bundleno = 1228 (0x4cc), region = 44  ;;  %s3044_s30 = smov (!%p224_p2), 8  }
   0x8   : > { %s3045_s7 = smov (!%p224_p2), 16   ;;  %s3047_s11 = smov (!%p224_p2), 24  }
   0x9   : > { %s3048_s12 = smov (!%p224_p2), 32   ;;  %s3049_s13 = smov (!%p224_p2), 40  }
   0xa   : > { %s3050_s22 = smov (!%p224_p2), 48   ;;  %s3051_s8 = smov (!%p224_p2), 56  }
   0xb   : > { %s3052_s16 = smov (!%p224_p2), 64  }
   0xc   : > { %vm496_vm0 = vcmask 64512   ;;  %v3042_v0 = vmov 0.0   ;;  %vm499_vm1 = vcmask 58368   ;;  %s4355_s24 = smov (!%p3101_p3, %s2792_s24), 1  ;;  %v3046_v7 = vmov 1966171168  }
   0xd   : > { %497 = vst.msk [vmem:[#allocation2] sm:$0xff] %vm496_vm0, %v3042_v0  ;;  %498 = vst.msk [vmem:[#allocation2 + $0x8] sm:$0xff] %vm496_vm0, %v3042_v0  ;;  %s2870_s5 = sshll.u32 %s4355_s24, 4  ;;  %v279_v8 = vunpack.c.l.s4 %v3046_v7  ;;  %v281_v9 = vlaneseq  ;;  %vm463_vm2 = vcmask 31744   ;;  %vm1930_vm3 = vcmask 130048   ;;  %s2801_s17 = sshll.u32 %s4355_s24, 1 }
   0xe   : > { %501 = vst.msk [vmem:[#allocation2 + $0x18] sm:$0xff] %vm496_vm0, %v3042_v0  ;;  %502 = vst.msk [vmem:[#allocation2 + $0x20] sm:$0xff] %vm496_vm0, %v3042_v0  ;;  %s266_s28 = scalar_lea.vmem %s4347_s1, %s2870_s5  ;;  %s261_s10 = scalar_lea.vmem %s4346_s0, %s2870_s5  ;;  %vm1963_vm4 = vcmask 195584   ;;  %vm1996_vm5 = vcmask 261120   ;;  %vm2029_vm6 = vcmask 326656   ;;  %vm2062_vm7 = vcmask 392192  }
   0xf   : > { %504 = vst.msk [vmem:[#allocation2 + $0x30] sm:$0xff] %vm496_vm0, %v3042_v0  ;;  %505 = vst.msk [vmem:[#allocation2 + $0x38] sm:$0xff] %vm496_vm0, %v3042_v0  ;;  %v273_v1 = vld [vmem:[%s266_s28] sm:$0xff]  ;;  %v274_v2 = vld [vmem:[%s266_s28 + $0x8] sm:$0xff]  ;;  %v280_v10 = vunpack.c.0.s8 %v279_v8  ;;  %v282_v11 = vshrl.u32 %v281_v9, 7  ;;  %vm2095_vm8 = vcmask 457728   ;;  %s270_s20 = scalar_lea.vmem %s4352_s6, %s2801_s17 }
  0x10   : > { %507 = vst.msk [vmem:[#allocation2 + $0x48] sm:$0xff] %vm496_vm0, %v3042_v0  ;;  %508 = vst.msk [vmem:[#allocation2 + $0x50] sm:$0xff] %vm496_vm0, %v3042_v0  ;;  %457 = vrot.lane.b32.xlu0 %v273_v1, %s3043_s29  ;;  %v271_v12 = vld [vmem:[%s261_s10] sm:$0xff]  ;;  %v272_v15 = vld [vmem:[%s261_s10 + $0x8] sm:$0xff]  ;;  %vm2128_vm9 = vcmask 523264   ;;  %vm2177_vm10 = vcmask 588800  }
  0x11   : > { %510 = vst.msk [vmem:[#allocation2 + $0x60] sm:$0xff] %vm496_vm0, %v3042_v0  ;;  %511 = vst.msk [vmem:[#allocation2 + $0x68] sm:$0xff] %vm496_vm0, %v3042_v0  ;;  %v3177_v13 = vsub.s32 %v280_v10, %v282_v11  ;;  %v277_v14 = vcombine.high %v271_v12, %v271_v12  ;;  %v326_v18 = vcombine.high %v272_v15, %v272_v15  ;;  %v377_v31 = vsub.s32 0, %v282_v11 }
  0x12   : > { %513 = vst.msk [vmem:[#allocation2 + $0x78] sm:$0xff] %vm496_vm0, %v3042_v0  ;;  %514 = vst.msk [vmem:[#allocation2 + $0x80] sm:$0xff] %vm496_vm0, %v3042_v0  ;;  %vm2724_vm11 = vcmp.lt.s32.totalorder %v281_v9, 256 }
  0x13   : > { %516 = vst.msk [vmem:[#allocation2 + $0x90] sm:$0xff] %vm496_vm0, %v3042_v0  ;;  %517 = vst.msk [vmem:[#allocation2 + $0x98] sm:$0xff] %vm496_vm0, %v3042_v0  ;;  %v284_v16 = vrot.slane %v271_v12, %v3177_v13  ;;  %v291_v17 = vrot.slane %v277_v14, %v3177_v13  ;;  %v333_v19 = vrot.slane %v272_v15, %v3177_v13 }
  0x14   : > { %519 = vst.msk [vmem:[#allocation2 + $0xa8] sm:$0xff] %vm496_vm0, %v3042_v0  ;;  %520 = vst.msk [vmem:[#allocation2 + $0xb0] sm:$0xff] %vm496_vm0, %v3042_v0  ;;  %v617_v3 = vld [vmem:[#allocation2 + $0x1] sm:$0xff]  ;;  %459 = vrot.lane.b32.xlu0 %v274_v2, %s3043_s29  ;;  %v340_v22 = vrot.slane %v326_v18, %v3177_v13 }
  0x15   : > { %522 = vst.msk [vmem:[#allocation2 + $0xc0] sm:$0xff] %vm496_vm0, %v3042_v0  ;;  %523 = vst.msk [vmem:[#allocation2 + $0xc8] sm:$0xff] %vm496_vm0, %v3042_v0  ;;  %906 = vrot.lane.b32.xlu1 %v617_v3, %s3044_s30  ;;  %v649_v5 = vld [vmem:[#allocation2 + $0x2] sm:$0xff]  ;;  %v292_v20 = vcombine.high %v284_v16, %v284_v16  ;;  %v293_v21 = vcombine.high %v291_v17, %v291_v17  ;;  %v341_v23 = vcombine.high %v333_v19, %v333_v19 }
  0x16   : > { %525 = vst.msk [vmem:[#allocation2 + $0xd8] sm:$0xff] %vm496_vm0, %v3042_v0  ;;  %526 = vst.msk [vmem:[#allocation2 + $0xe0] sm:$0xff] %vm496_vm0, %v3042_v0  ;;  %v300_v24 = vrot.slane %v284_v16, %v3177_v13  ;;  %v307_v26 = vrot.slane %v291_v17, %v3177_v13  ;;  %v342_v28 = vcombine.high %v340_v22, %v340_v22 }
  0x17   : > { %528 = vst.msk [vmem:[#allocation2 + $0xf0] sm:$0xff] %vm496_vm0, %v3042_v0  ;;  %529 = vst.msk [vmem:[#allocation2 + $0xf8] sm:$0xff] %vm496_vm0, %v3042_v0  ;;  %v314_v25 = vrot.slane %v292_v20, %v3177_v13  ;;  %v321_v27 = vrot.slane %v293_v21, %v3177_v13  ;;  %v349_v29 = vrot.slane %v333_v19, %v3177_v13 }
  0x18   : > { %531 = vst.msk [vmem:[#allocation2 + $0x108] sm:$0xff] %vm496_vm0, %v3042_v0  ;;  %532 = vst.msk [vmem:[#allocation2 + $0x110] sm:$0xff] %vm496_vm0, %v3042_v0  ;;  %1034 = vrot.lane.b32.xlu0 %v649_v5, %s3045_s7  ;;  %v363_v30 = vrot.slane %v341_v23, %v3177_v13  ;;  %v322_v32 = vcombine.high %v300_v24, %v300_v24  ;;  %v323_v34 = vcombine.high %v307_v26, %v307_v26 }
  0x19   : > { %534 = vst.msk [vmem:[#allocation2 + $0x120] sm:$0xff] %vm496_vm0, %v3042_v0  ;;  %535 = vst.msk [vmem:[#allocation2 + $0x128] sm:$0xff] %vm496_vm0, %v3042_v0  ;;  %v324_v33 = vcombine.high %v314_v25, %v314_v25  ;;  %v356_v35 = vrot.slane %v340_v22, %v3177_v13  ;;  %v325_v36 = vcombine.high %v321_v27, %v321_v27 }
  0x1a   : > { %537 = vst.msk [vmem:[#allocation2 + $0x138] sm:$0xff] %vm496_vm0, %v3042_v0  ;;  %538 = vst.msk [vmem:[#allocation2 + $0x140] sm:$0xff] %vm496_vm0, %v3042_v0  ;;  %v370_v37 = vrot.slane %v342_v28, %v3177_v13  ;;  %v371_v38 = vcombine.high %v349_v29, %v349_v29  ;;  %v373_v39 = vcombine.high %v363_v30, %v363_v30 }
  0x1b   : > { %540 = vst.msk [vmem:[#allocation2 + $0x150] sm:$0xff] %vm496_vm0, %v3042_v0  ;;  %541 = vst.msk [vmem:[#allocation2 + $0x158] sm:$0xff] %vm496_vm0, %v3042_v0  ;;  %v378_v40 = vrot.slane %v300_v24, %v377_v31  ;;  %v382_v41 = vrot.slane %v314_v25, %v377_v31  ;;  %v386_v42 = vrot.slane %v322_v32, %v377_v31 }
  0x1c   : > { %543 = vst.msk [vmem:[#allocation2 + $0x168] sm:$0xff] %vm496_vm0, %v3042_v0  ;;  %544 = vst.msk [vmem:[#allocation2 + $0x170] sm:$0xff] %vm496_vm0, %v3042_v0  ;;  %v390_v43 = vrot.slane %v324_v33, %v377_v31  ;;  %v372_v44 = vcombine.high %v356_v35, %v356_v35  ;;  %v394_v45 = vrot.slane %v307_v26, %v377_v31 }
  0x1d   : > { %546 = vst.msk [vmem:[#allocation2 + $0x180] sm:$0xff] %vm496_vm0, %v3042_v0  ;;  %547 = vst.msk [vmem:[#allocation2 + $0x188] sm:$0xff] %vm496_vm0, %v3042_v0  ;;  %v398_v46 = vrot.slane %v321_v27, %v377_v31  ;;  %v402_v47 = vrot.slane %v323_v34, %v377_v31  ;;  %v374_v48 = vcombine.high %v370_v37, %v370_v37 }
  0x1e   : > { %549 = vst.msk [vmem:[#allocation2 + $0x198] sm:$0xff] %vm496_vm0, %v3042_v0  ;;  %550 = vst.msk [vmem:[#allocation2 + $0x1a0] sm:$0xff] %vm496_vm0, %v3042_v0  ;;  %v406_v49 = vrot.slane %v325_v36, %v377_v31  ;;  %v410_v50 = vrot.slane %v349_v29, %v377_v31  ;;  %v414_v51 = vrot.slane %v363_v30, %v377_v31 }
  0x1f   : > { %500 = vst.msk [vmem:[#allocation2 + $0x10] sm:$0x3] %vm499_vm1, %v3042_v0  ;;  %503 = vst.msk [vmem:[#allocation2 + $0x28] sm:$0x3] %vm499_vm1, %v3042_v0  ;;  %v418_v52 = vrot.slane %v371_v38, %v377_v31  ;;  %v422_v53 = vrot.slane %v373_v39, %v377_v31  ;;  %v426_v54 = vrot.slane %v356_v35, %v377_v31  ;;  %v2169_v35 = vld [vmem:[%s4348_s2 + $0x40] sm:$0xff]  ;;  %v2167_v38 = vld [vmem:[%s4348_s2 + $0x30] sm:$0xff] }
  0x20   : > { %506 = vst.msk [vmem:[#allocation2 + $0x40] sm:$0x3] %vm499_vm1, %v3042_v0  ;;  %509 = vst.msk [vmem:[#allocation2 + $0x58] sm:$0x3] %vm499_vm1, %v3042_v0  ;;  %v430_v55 = vrot.slane %v370_v37, %v377_v31  ;;  %v434_v61 = vrot.slane %v372_v44, %v377_v31  ;;  %v438_v1 = vrot.slane %v374_v48, %v377_v31  ;;  %2947 = vmatprep.subr.mxu0 %v2169_v35  ;;  %v2168_v37 = vld [vmem:[%s4348_s2 + $0x38] sm:$0xff]  ;;  %v2161_v48 = vld [vmem:[%s4348_s2] sm:$0xff] }
  0x21   : > { %512 = vst.msk [vmem:[#allocation2 + $0x70] sm:$0x3] %vm499_vm1, %v3042_v0  ;;  %515 = vst.msk [vmem:[#allocation2 + $0x88] sm:$0x3] %vm499_vm1, %v3042_v0  ;;  %2948 = vmatpush3.msra.mxu0 %v2169_v35 }
  0x22   : > { %518 = vst.msk [vmem:[#allocation2 + $0xa0] sm:$0x3] %vm499_vm1, %v3042_v0  ;;  %521 = vst.msk [vmem:[#allocation2 + $0xb8] sm:$0x3] %vm499_vm1, %v3042_v0  ;;  %2949 = vmatprep.subr.mxu0 %v2168_v37 }
  0x23   : > { %524 = vst.msk [vmem:[#allocation2 + $0xd0] sm:$0x3] %vm499_vm1, %v3042_v0  ;;  %527 = vst.msk [vmem:[#allocation2 + $0xe8] sm:$0x3] %vm499_vm1, %v3042_v0  ;;  %2950 = vmatpush3.msra.mxu0 %v2168_v37 }
  0x24   : > { %530 = vst.msk [vmem:[#allocation2 + $0x100] sm:$0x3] %vm499_vm1, %v3042_v0  ;;  %533 = vst.msk [vmem:[#allocation2 + $0x118] sm:$0x3] %vm499_vm1, %v3042_v0  ;;  %2951 = vmatprep.subr.mxu0 %v2167_v38 }
  0x25   : > { %536 = vst.msk [vmem:[#allocation2 + $0x130] sm:$0x3] %vm499_vm1, %v3042_v0  ;;  %539 = vst.msk [vmem:[#allocation2 + $0x148] sm:$0x3] %vm499_vm1, %v3042_v0  ;;  %2952 = vmatpush3.msra.mxu0 %v2167_v38 }
  0x26   : > { %542 = vst.msk [vmem:[#allocation2 + $0x160] sm:$0x3] %vm499_vm1, %v3042_v0  ;;  %545 = vst.msk [vmem:[#allocation2 + $0x178] sm:$0x3] %vm499_vm1, %v3042_v0  ;;  %v618_v4 = vld [vmem:[#allocation2 + $0x9] sm:$0xff] }
  0x27   : > { %548 = vst.msk [vmem:[#allocation2 + $0x190] sm:$0x3] %vm499_vm1, %v3042_v0  ;;  %551 = vst.msk [vmem:[#allocation2 + $0x1a8] sm:$0x3] %vm499_vm1, %v3042_v0  ;;  %908 = vrot.lane.b32.xlu1 %v618_v4, %s3044_s30  ;;  %v650_v6 = vld [vmem:[#allocation2 + $0xa] sm:$0xff] }
  0x2b   : > { %1036 = vrot.lane.b32.xlu1 %v650_v6, %s3045_s7 }
  0x82   : > { %v3191_v56 = vpop.permute.xlu0 %457 }
  0x83   : > { %v464_v57 = vsel %vm463_vm2, %v378_v40, %v3191_v56  ;;  %v466_v58 = vsel %vm463_vm2, %v382_v41, %v3191_v56  ;;  %v468_v59 = vsel %vm463_vm2, %v386_v42, %v3191_v56  ;;  %v470_v60 = vsel %vm463_vm2, %v390_v43, %v3191_v56 }
  0x84   : > { %553 = vst.msk [vmem:[#allocation2 + $0x19] sm:$0xff] %vm496_vm0, %v464_v57  ;;  %555 = vst.msk [vmem:[#allocation2 + $0x31] sm:$0xff] %vm496_vm0, %v466_v58  ;;  %v472_v62 = vsel %vm463_vm2, %v394_v45, %v3191_v56  ;;  %v474_v63 = vsel %vm463_vm2, %v398_v46, %v3191_v56  ;;  %v476_v0 = vsel %vm463_vm2, %v402_v47, %v3191_v56 }
  0x85   : > { %557 = vst.msk [vmem:[#allocation2 + $0x49] sm:$0xff] %vm496_vm0, %v468_v59  ;;  %559 = vst.msk [vmem:[#allocation2 + $0x61] sm:$0xff] %vm496_vm0, %v470_v60  ;;  %v478_v2 = vsel %vm463_vm2, %v406_v49, %v3191_v56  ;;  %v480_v3 = vsel %vm463_vm2, %v410_v50, %v3191_v56  ;;  %v482_v4 = vsel %vm463_vm2, %v414_v51, %v3191_v56 }
  0x86   : > { %561 = vst.msk [vmem:[#allocation2 + $0x79] sm:$0xff] %vm496_vm0, %v472_v62  ;;  %563 = vst.msk [vmem:[#allocation2 + $0x91] sm:$0xff] %vm496_vm0, %v474_v63  ;;  %v460_v5 = vpop.permute.xlu0 %459  ;;  %v484_v6 = vsel %vm463_vm2, %v418_v52, %v3191_v56  ;;  %v486_v7 = vsel %vm463_vm2, %v422_v53, %v3191_v56  ;;  %v488_v8 = vsel %vm463_vm2, %v426_v54, %v3191_v56 }
  0x87   : > { %565 = vst.msk [vmem:[#allocation2 + $0xa9] sm:$0xff] %vm496_vm0, %v476_v0  ;;  %567 = vst.msk [vmem:[#allocation2 + $0xc1] sm:$0xff] %vm496_vm0, %v478_v2  ;;  %v490_v10 = vsel %vm463_vm2, %v430_v55, %v3191_v56  ;;  %v465_v11 = vsel %vm463_vm2, %v378_v40, %v460_v5  ;;  %v467_v12 = vsel %vm463_vm2, %v382_v41, %v460_v5  ;;  %v2166_v40 = vld [vmem:[%s4348_s2 + $0x28] sm:$0xff]  ;;  %v2165_v41 = vld [vmem:[%s4348_s2 + $0x20] sm:$0xff]  ;;  %v907_v62 = vpop.permute.xlu1 %906 }
  0x88   : > { %569 = vst.msk [vmem:[#allocation2 + $0xd9] sm:$0xff] %vm496_vm0, %v480_v3  ;;  %571 = vst.msk [vmem:[#allocation2 + $0xf1] sm:$0xff] %vm496_vm0, %v482_v4  ;;  %v469_v14 = vsel %vm463_vm2, %v386_v42, %v460_v5  ;;  %v471_v15 = vsel %vm463_vm2, %v390_v43, %v460_v5  ;;  %v473_v16 = vsel %vm463_vm2, %v394_v45, %v460_v5  ;;  %2953 = vmatprep.subr.mxu0 %v2166_v40  ;;  %v2164_v43 = vld [vmem:[%s4348_s2 + $0x18] sm:$0xff]  ;;  %v2163_v45 = vld [vmem:[%s4348_s2 + $0x10] sm:$0xff] }
  0x89   : > { %573 = vst.msk [vmem:[#allocation2 + $0x109] sm:$0xff] %vm496_vm0, %v484_v6  ;;  %575 = vst.msk [vmem:[#allocation2 + $0x121] sm:$0xff] %vm496_vm0, %v486_v7  ;;  %v475_v17 = vsel %vm463_vm2, %v398_v46, %v460_v5  ;;  %v477_v18 = vsel %vm463_vm2, %v402_v47, %v460_v5  ;;  %v479_v19 = vsel %vm463_vm2, %v406_v49, %v460_v5  ;;  %2954 = vmatpush3.msra.mxu0 %v2166_v40  ;;  %v2162_v46 = vld [vmem:[%s4348_s2 + $0x8] sm:$0xff] }
  0x8a   : > { %577 = vst.msk [vmem:[#allocation2 + $0x139] sm:$0xff] %vm496_vm0, %v488_v8  ;;  %579 = vst.msk [vmem:[#allocation2 + $0x151] sm:$0xff] %vm496_vm0, %v490_v10  ;;  %v481_v20 = vsel %vm463_vm2, %v410_v50, %v460_v5  ;;  %v483_v21 = vsel %vm463_vm2, %v414_v51, %v460_v5  ;;  %v485_v22 = vsel %vm463_vm2, %v418_v52, %v460_v5  ;;  %2955 = vmatprep.subr.mxu0 %v2165_v41 }
  0x8b   : > { %554 = vst.msk [vmem:[#allocation2 + $0x21] sm:$0xff] %vm496_vm0, %v465_v11  ;;  %556 = vst.msk [vmem:[#allocation2 + $0x39] sm:$0xff] %vm496_vm0, %v467_v12  ;;  %v487_v23 = vsel %vm463_vm2, %v422_v53, %v460_v5  ;;  %v489_v24 = vsel %vm463_vm2, %v426_v54, %v460_v5  ;;  %v491_v25 = vsel %vm463_vm2, %v430_v55, %v460_v5  ;;  %v3262_v27 = vld [vmem:[#allocation2 + $0x18] sm:$0xff]  ;;  %v3297_v39 = vld [vmem:[#allocation2 + $0x30] sm:$0xff]  ;;  %2956 = vmatpush3.msra.mxu0 %v2165_v41 }
  0x8c   : > { %558 = vst.msk [vmem:[#allocation2 + $0x51] sm:$0xff] %vm496_vm0, %v469_v14  ;;  %560 = vst.msk [vmem:[#allocation2 + $0x69] sm:$0xff] %vm496_vm0, %v471_v15  ;;  %v492_v26 = vsel %vm463_vm2, %v434_v61, %v3191_v56  ;;  %v493_v28 = vsel %vm463_vm2, %v434_v61, %v460_v5  ;;  %v494_v29 = vsel %vm463_vm2, %v438_v1, %v3191_v56  ;;  %1162 = vrot.lane.b32.xlu0 %v3262_v27, %s3047_s11  ;;  %v713_v32 = vld [vmem:[#allocation2 + $0x19] sm:$0xff]  ;;  %v810_v44 = vld [vmem:[#allocation2 + $0x31] sm:$0xff] }
  0x8d   : > { %562 = vst.msk [vmem:[#allocation2 + $0x81] sm:$0xff] %vm496_vm0, %v473_v16  ;;  %564 = vst.msk [vmem:[#allocation2 + $0x99] sm:$0xff] %vm496_vm0, %v475_v17  ;;  %v495_v30 = vsel %vm463_vm2, %v438_v1, %v460_v5  ;;  %2957 = vmatprep.subr.mxu0 %v2164_v43  ;;  %v3339_v51 = vld [vmem:[#allocation2 + $0x48] sm:$0xff]  ;;  %v3363_v57 = vld [vmem:[#allocation2 + $0x60] sm:$0xff]  ;;  %v1035_v1 = vpop.permute.xlu0 %1034 }
  0x8e   : > { %566 = vst.msk [vmem:[#allocation2 + $0xb1] sm:$0xff] %vm496_vm0, %v477_v18  ;;  %568 = vst.msk [vmem:[#allocation2 + $0xc9] sm:$0xff] %vm496_vm0, %v479_v19  ;;  %2958 = vmatpush3.msra.mxu0 %v2164_v43  ;;  %v812_v53 = vld [vmem:[#allocation2 + $0x49] sm:$0xff]  ;;  %v814_v59 = vld [vmem:[#allocation2 + $0x61] sm:$0xff] }
  0x8f   : > { %570 = vst.msk [vmem:[#allocation2 + $0xe1] sm:$0xff] %vm496_vm0, %v481_v20  ;;  %572 = vst.msk [vmem:[#allocation2 + $0xf9] sm:$0xff] %vm496_vm0, %v483_v21  ;;  %2959 = vmatprep.subr.mxu0 %v2163_v45  ;;  %v3391_v4 = vld [vmem:[#allocation2 + $0x78] sm:$0xff] }
  0x90   : > { %574 = vst.msk [vmem:[#allocation2 + $0x111] sm:$0xff] %vm496_vm0, %v485_v22  ;;  %576 = vst.msk [vmem:[#allocation2 + $0x129] sm:$0xff] %vm496_vm0, %v487_v23  ;;  %1290 = vrot.lane.b32.xlu0 %v713_v32, %s3048_s12  ;;  %2960 = vmatpush3.msra.mxu0 %v2163_v45  ;;  %v816_v11 = vld [vmem:[#allocation2 + $0x79] sm:$0xff] }
  0x91   : > { %578 = vst.msk [vmem:[#allocation2 + $0x141] sm:$0xff] %vm496_vm0, %v489_v24  ;;  %580 = vst.msk [vmem:[#allocation2 + $0x159] sm:$0xff] %vm496_vm0, %v491_v25  ;;  %2961 = vmatprep.subr.mxu0 %v2162_v46  ;;  %v585_v23 = vld [vmem:[#allocation2] sm:$0xff] }
  0x92   : > { %581 = vst.msk [vmem:[#allocation2 + $0x169] sm:$0xff] %vm496_vm0, %v492_v26  ;;  %582 = vst.msk [vmem:[#allocation2 + $0x171] sm:$0xff] %vm496_vm0, %v493_v28  ;;  %v3277_v31 = vld [vmem:[#allocation2 + $0x20] sm:$0xff]  ;;  %v3308_v42 = vld [vmem:[#allocation2 + $0x38] sm:$0xff]  ;;  %2962 = vmatpush3.msra.mxu0 %v2162_v46  ;;  %v1898_v25 = vsel %vm496_vm0, %v585_v23, %v907_v62 }
  0x93   : > { %583 = vst.msk [vmem:[#allocation2 + $0x181] sm:$0xff] %vm496_vm0, %v494_v29  ;;  %584 = vst.msk [vmem:[#allocation2 + $0x189] sm:$0xff] %vm496_vm0, %v495_v30  ;;  %1164 = vrot.lane.b32.xlu1 %v3277_v31, %s3047_s11  ;;  %v714_v33 = vld [vmem:[#allocation2 + $0x21] sm:$0xff]  ;;  %v811_v47 = vld [vmem:[#allocation2 + $0x39] sm:$0xff]  ;;  %2963 = vmatprep.subr.mxu0 %v2161_v48  ;;  %v1931_v29 = vsel %vm1930_vm3, %v1898_v25, %v1035_v1 }
  0x94   : > { %1292 = vrot.lane.b32.xlu0 %v714_v33, %s3048_s12  ;;  %v745_v34 = vld [vmem:[#allocation2 + $0x1a] sm:$0xff]  ;;  %v746_v36 = vld [vmem:[#allocation2 + $0x22] sm:$0xff]  ;;  %v842_v49 = vld [vmem:[#allocation2 + $0x32] sm:$0xff]  ;;  %2964 = vmatpush3.msra.mxu0 %v2161_v48 }
  0x95   : > { %v843_v50 = vld [vmem:[#allocation2 + $0x3a] sm:$0xff]  ;;  %v3344_v52 = vld [vmem:[#allocation2 + $0x50] sm:$0xff]  ;;  %v3368_v58 = vld [vmem:[#allocation2 + $0x68] sm:$0xff] }
  0x96   : > { %v813_v54 = vld [vmem:[#allocation2 + $0x51] sm:$0xff]  ;;  %v815_v60 = vld [vmem:[#allocation2 + $0x69] sm:$0xff]  ;;  %v3398_v7 = vld [vmem:[#allocation2 + $0x80] sm:$0xff] }
  0x97   : > { %910 = vrot.lane.b32.xlu1 %v713_v32, %s3044_s30  ;;  %v844_v55 = vld [vmem:[#allocation2 + $0x4a] sm:$0xff]  ;;  %v845_v56 = vld [vmem:[#allocation2 + $0x52] sm:$0xff]  ;;  %v846_v61 = vld [vmem:[#allocation2 + $0x62] sm:$0xff] }
  0x98   : > { %912 = vrot.lane.b32.xlu0 %v714_v33, %s3044_s30  ;;  %v847_v63 = vld [vmem:[#allocation2 + $0x6a] sm:$0xff]  ;;  %v817_v15 = vld [vmem:[#allocation2 + $0x81] sm:$0xff]  ;;  %v3448_v46 = vld [vmem:[#allocation2 + $0x98] sm:$0xff] }
  0x99   : > { %v3383_v0 = vpop.permute.xlu1 %908  ;;  %v848_v18 = vld [vmem:[#allocation2 + $0x7a] sm:$0xff]  ;;  %v849_v24 = vld [vmem:[#allocation2 + $0x82] sm:$0xff] }
  0x9b   : > { %1418 = vrot.lane.b32.xlu1 %v745_v34, %s3049_s13 }
  0x9c   : > { %1420 = vrot.lane.b32.xlu0 %v746_v36, %s3049_s13 }
  0x9d   : > { %v3389_v2 = vpop.permute.xlu1 %1036 }
  0x9f   : > { %1038 = vrot.lane.b32.xlu1 %v745_v34, %s3045_s7  ;;  %v586_v34 = vld [vmem:[#allocation2 + $0x8] sm:$0xff] }
  0xa0   : > { %1040 = vrot.lane.b32.xlu0 %v746_v36, %s3045_s7  ;;  %v3435_v36 = vld [vmem:[#allocation2 + $0x90] sm:$0xff]  ;;  %v1899_v40 = vsel %vm496_vm0, %v586_v34, %v3383_v0 }
  0xa3   : > { %1546 = vrot.lane.b32.xlu1 %v3297_v39, %s3050_s22 }
  0xa4   : > { %1548 = vrot.lane.b32.xlu0 %v3308_v42, %s3050_s22 }
  0xa7   : > { %1166 = vrot.lane.b32.xlu1 %v3297_v39, %s3047_s11 }
  0xa8   : > { %1168 = vrot.lane.b32.xlu0 %v3308_v42, %s3047_s11 }
  0xab   : > { %1674 = vrot.lane.b32.xlu1 %v810_v44, %s3051_s8 }
  0xac   : > { %1676 = vrot.lane.b32.xlu0 %v811_v47, %s3051_s8 }
  0xaf   : > { %1294 = vrot.lane.b32.xlu1 %v810_v44, %s3048_s12 }
  0xb0   : > { %914 = vrot.lane.b32.xlu0 %v810_v44, %s3044_s30 }
  0xb3   : > { %1802 = vrot.lane.b32.xlu1 %v842_v49, %s3052_s16 }
  0xb4   : > { %1422 = vrot.lane.b32.xlu0 %v842_v49, %s3049_s13 }
  0xb7   : > { %1296 = vrot.lane.b32.xlu1 %v811_v47, %s3048_s12 }
  0xb8   : > { %916 = vrot.lane.b32.xlu0 %v811_v47, %s3044_s30  ;;  %v1932_v47 = vsel %vm1930_vm3, %v1899_v40, %v3389_v2  ;;  %v850_v2 = vld [vmem:[#allocation2 + $0x92] sm:$0xff] }
  0xbb   : > { %1804 = vrot.lane.b32.xlu1 %v843_v50, %s3052_s16 }
  0xbc   : > { %1424 = vrot.lane.b32.xlu0 %v843_v50, %s3049_s13 }
  0xbf   : > { %1042 = vrot.lane.b32.xlu1 %v842_v49, %s3045_s7 }
  0xc0   : > { %1044 = vrot.lane.b32.xlu0 %v843_v50, %s3045_s7 }
  0xc3   : > { %1550 = vrot.lane.b32.xlu1 %v3339_v51, %s3050_s22 }
  0xc4   : > { %1552 = vrot.lane.b32.xlu0 %v3344_v52, %s3050_s22 }
  0xc7   : > { %1170 = vrot.lane.b32.xlu1 %v3339_v51, %s3047_s11 }
  0xc8   : > { %1172 = vrot.lane.b32.xlu0 %v3344_v52, %s3047_s11 }
  0xcb   : > { %1678 = vrot.lane.b32.xlu1 %v812_v53, %s3051_s8 }
  0xcc   : > { %1680 = vrot.lane.b32.xlu0 %v813_v54, %s3051_s8 }
  0xcf   : > { %1298 = vrot.lane.b32.xlu1 %v812_v53, %s3048_s12 }
  0xd0   : > { %918 = vrot.lane.b32.xlu0 %v812_v53, %s3044_s30 }
  0xd3   : > { %1806 = vrot.lane.b32.xlu1 %v844_v55, %s3052_s16 }
  0xd4   : > { %1426 = vrot.lane.b32.xlu0 %v844_v55, %s3049_s13 }
  0xd7   : > { %1300 = vrot.lane.b32.xlu1 %v813_v54, %s3048_s12 }
  0xd8   : > { %920 = vrot.lane.b32.xlu0 %v813_v54, %s3044_s30 }
  0xdb   : > { %1808 = vrot.lane.b32.xlu1 %v845_v56, %s3052_s16 }
  0xdc   : > { %1428 = vrot.lane.b32.xlu0 %v845_v56, %s3049_s13 }
  0xdf   : > { %1046 = vrot.lane.b32.xlu1 %v844_v55, %s3045_s7  ;;  %v818_v55 = vld [vmem:[#allocation2 + $0x91] sm:$0xff] }
  0xe0   : > { %1048 = vrot.lane.b32.xlu0 %v845_v56, %s3045_s7 }
  0xe3   : > { %1554 = vrot.lane.b32.xlu1 %v3363_v57, %s3050_s22 }
  0xe4   : > { %1556 = vrot.lane.b32.xlu0 %v3368_v58, %s3050_s22 }
  0xe7   : > { %1174 = vrot.lane.b32.xlu1 %v3363_v57, %s3047_s11 }
  0xe8   : > { %1176 = vrot.lane.b32.xlu0 %v3368_v58, %s3047_s11 }
  0xeb   : > { %1682 = vrot.lane.b32.xlu1 %v814_v59, %s3051_s8 }
  0xec   : > { %1684 = vrot.lane.b32.xlu0 %v815_v60, %s3051_s8 }
  0xef   : > { %1302 = vrot.lane.b32.xlu1 %v814_v59, %s3048_s12 }
  0xf0   : > { %922 = vrot.lane.b32.xlu0 %v814_v59, %s3044_s30 }
  0xf3   : > { %1810 = vrot.lane.b32.xlu1 %v846_v61, %s3052_s16 }
  0xf4   : > { %1430 = vrot.lane.b32.xlu0 %v846_v61, %s3049_s13 }
  0xf7   : > { %1304 = vrot.lane.b32.xlu1 %v815_v60, %s3048_s12 }
  0xf8   : > { %924 = vrot.lane.b32.xlu0 %v815_v60, %s3044_s30 }
  0xfb   : > { %1812 = vrot.lane.b32.xlu1 %v847_v63, %s3052_s16 }
  0xfc   : > { %1432 = vrot.lane.b32.xlu0 %v847_v63, %s3049_s13 }
  0xfe   : > { %v1163_v3 = vpop.permute.xlu0 %1162 }
  0xff   : > { %1050 = vrot.lane.b32.xlu1 %v846_v61, %s3045_s7  ;;  %v1964_v30 = vsel %vm1963_vm4, %v1931_v29, %v1163_v3 }
 0x100   : > { %1052 = vrot.lane.b32.xlu0 %v847_v63, %s3045_s7  ;;  %v819_v63 = vld [vmem:[#allocation2 + $0x99] sm:$0xff] }
 0x102   : > { %v1291_v6 = vpop.permute.xlu0 %1290 }
 0x103   : > { %1558 = vrot.lane.b32.xlu1 %v3391_v4, %s3050_s22  ;;  %v1997_v35 = vsel %vm1996_vm5, %v1964_v30, %v1291_v6  ;;  %v3508_v30 = vld [vmem:[#allocation2 + $0xb0] sm:$0xff] }
 0x104   : > { %1560 = vrot.lane.b32.xlu0 %v3398_v7, %s3050_s22 }
 0x105   : > { %v3396_v5 = vpop.permute.xlu1 %1164 }
 0x106   : > { %v3404_v8 = vpop.permute.xlu0 %1292  ;;  %v1965_v48 = vsel %vm1963_vm4, %v1932_v47, %v3396_v5 }
 0x107   : > { %1178 = vrot.lane.b32.xlu1 %v3391_v4, %s3047_s11  ;;  %v1998_v53 = vsel %vm1996_vm5, %v1965_v48, %v3404_v8 }
 0x108   : > { %1180 = vrot.lane.b32.xlu0 %v3398_v7, %s3047_s11 }
 0x109   : > { %v3406_v10 = vpop.permute.xlu1 %910 }
 0x10a   : > { %v3411_v12 = vpop.permute.xlu0 %912 }
 0x10b   : > { %1686 = vrot.lane.b32.xlu1 %v816_v11, %s3051_s8 }
 0x10c   : > { %1688 = vrot.lane.b32.xlu0 %v817_v15, %s3051_s8 }
 0x10d   : > { %v1419_v14 = vpop.permute.xlu1 %1418 }
 0x10e   : > { %v1421_v16 = vpop.permute.xlu0 %1420  ;;  %v2030_v37 = vsel %vm2029_vm6, %v1997_v35, %v1419_v14 }
 0x10f   : > { %1306 = vrot.lane.b32.xlu1 %v816_v11, %s3048_s12  ;;  %v2031_v54 = vsel %vm2029_vm6, %v1998_v53, %v1421_v16  ;;  %v1900_v16 = vsel %vm496_vm0, %v3262_v27, %v3406_v10 }
 0x110   : > { %926 = vrot.lane.b32.xlu0 %v816_v11, %s3044_s30  ;;  %v851_v11 = vld [vmem:[#allocation2 + $0x9a] sm:$0xff] }
 0x111   : > { %v3415_v17 = vpop.permute.xlu1 %1038 }
 0x112   : > { %v3419_v19 = vpop.permute.xlu0 %1040 }
 0x113   : > { %1814 = vrot.lane.b32.xlu1 %v848_v18, %s3052_s16 }
 0x114   : > { %1434 = vrot.lane.b32.xlu0 %v848_v18, %s3049_s13 }
 0x115   : > { %v1547_v20 = vpop.permute.xlu1 %1546 }
 0x116   : > { %v1549_v21 = vpop.permute.xlu0 %1548  ;;  %v2063_v38 = vsel %vm2062_vm7, %v2030_v37, %v1547_v20 }
 0x117   : > { %1308 = vrot.lane.b32.xlu1 %v817_v15, %s3048_s12  ;;  %v2064_v56 = vsel %vm2062_vm7, %v2031_v54, %v1549_v21 }
 0x118   : > { %928 = vrot.lane.b32.xlu0 %v817_v15, %s3044_s30 }
 0x119   : > { %v3423_v22 = vpop.permute.xlu1 %1166 }
 0x11a   : > { %v3428_v26 = vpop.permute.xlu0 %1168 }
 0x11b   : > { %1816 = vrot.lane.b32.xlu1 %v849_v24, %s3052_s16 }
 0x11c   : > { %1436 = vrot.lane.b32.xlu0 %v849_v24, %s3049_s13 }
 0x11d   : > { %v1675_v28 = vpop.permute.xlu1 %1674 }
 0x11e   : > { %v1677_v32 = vpop.permute.xlu0 %1676  ;;  %v2096_v41 = vsel %vm2095_vm8, %v2063_v38, %v1675_v28  ;;  %v3498_v28 = vld [vmem:[#allocation2 + $0xa8] sm:$0xff] }
 0x11f   : > { %1054 = vrot.lane.b32.xlu1 %v848_v18, %s3045_s7  ;;  %v2097_v59 = vsel %vm2095_vm8, %v2064_v56, %v1677_v32  ;;  %v1933_v18 = vsel %vm1930_vm3, %v1900_v16, %v3415_v17  ;;  %v1901_v32 = vsel %vm496_vm0, %v3277_v31, %v3411_v12  ;;  %v820_v12 = vld [vmem:[#allocation2 + $0xa9] sm:$0xff]  ;;  %v853_v56 = vld [vmem:[#allocation2 + $0xb2] sm:$0xff] }
 0x120   : > { %1056 = vrot.lane.b32.xlu0 %v849_v24, %s3045_s7  ;;  %v1966_v20 = vsel %vm1963_vm4, %v1933_v18, %v3423_v22  ;;  %v3570_v18 = vld [vmem:[#allocation2 + $0xc8] sm:$0xff] }
 0x121   : > { %v1295_v33 = vpop.permute.xlu1 %1294 }
 0x122   : > { %v3445_v44 = vpop.permute.xlu0 %914  ;;  %v1999_v24 = vsel %vm1996_vm5, %v1966_v20, %v1295_v33  ;;  %v1934_v33 = vsel %vm1930_vm3, %v1901_v32, %v3419_v19  ;;  %v823_v32 = vld [vmem:[#allocation2 + $0xc9] sm:$0xff] }
 0x123   : > { %1562 = vrot.lane.b32.xlu1 %v3435_v36, %s3050_s22  ;;  %v1967_v34 = vsel %vm1963_vm4, %v1934_v33, %v3428_v26 }
 0x124   : > { %1564 = vrot.lane.b32.xlu0 %v3448_v46, %s3050_s22 }
 0x125   : > { %v1803_v43 = vpop.permute.xlu1 %1802 }
 0x126   : > { %v2129_v45 = vsel %vm2128_vm9, %v2096_v41, %v1803_v43  ;;  %v1423_v50 = vpop.permute.xlu0 %1422 }
 0x127   : > { %2965 = vmatprep.mubr.msk.f32.mxu0 %vm2177_vm10, %v2129_v45  ;;  %1182 = vrot.lane.b32.xlu1 %v3435_v36, %s3047_s11  ;;  %v2032_v25 = vsel %vm2029_vm6, %v1999_v24, %v1423_v50  ;;  %v821_v45 = vld [vmem:[#allocation2 + $0xb1] sm:$0xff] }
 0x128   : > { %1184 = vrot.lane.b32.xlu0 %v3448_v46, %s3047_s11 }
 0x129   : > { %v1297_v49 = vpop.permute.xlu1 %1296 }
 0x12a   : > { %v3467_v61 = vpop.permute.xlu0 %916  ;;  %v2000_v38 = vsel %vm1996_vm5, %v1967_v34, %v1297_v49  ;;  %v852_v49 = vld [vmem:[#allocation2 + $0xaa] sm:$0xff] }
 0x12b   : > { %1690 = vrot.lane.b32.xlu1 %v818_v55, %s3051_s8  ;;  %v1903_v20 = vsel %vm496_vm0, %v3308_v42, %v3467_v61  ;;  %v822_v61 = vld [vmem:[#allocation2 + $0xc1] sm:$0xff] }
 0x12c   : > { %1692 = vrot.lane.b32.xlu0 %v819_v63, %s3051_s8 }
 0x12d   : > { %v1805_v60 = vpop.permute.xlu1 %1804 }
 0x12e   : > { %v2130_v62 = vsel %vm2128_vm9, %v2097_v59, %v1805_v60  ;;  %v1425_v1 = vpop.permute.xlu0 %1424 }
 0x12f   : > { %2966 = vmatmul.mubr.msk.f32.vlgmr.msra.gmra.mxu0 %vm2177_vm10, %v2130_v62  ;;  %1310 = vrot.lane.b32.xlu1 %v818_v55, %s3048_s12  ;;  %v2033_v31 = vsel %vm2029_vm6, %v2000_v38, %v1425_v1  ;;  %v1902_v62 = vsel %vm496_vm0, %v3297_v39, %v3445_v44 }
 0x130   : > { %930 = vrot.lane.b32.xlu0 %v818_v55, %s3044_s30 }
 0x131   : > { %v3473_v0 = vpop.permute.xlu1 %1042 }
 0x132   : > { %v3477_v5 = vpop.permute.xlu0 %1044 }
 0x133   : > { %1818 = vrot.lane.b32.xlu1 %v850_v2, %s3052_s16 }
 0x134   : > { %1438 = vrot.lane.b32.xlu0 %v850_v2, %s3049_s13 }
 0x135   : > { %v1551_v3 = vpop.permute.xlu1 %1550 }
 0x136   : > { %v1553_v8 = vpop.permute.xlu0 %1552  ;;  %v2065_v27 = vsel %vm2062_vm7, %v2032_v25, %v1551_v3 }
 0x137   : > { %1312 = vrot.lane.b32.xlu1 %v819_v63, %s3048_s12  ;;  %v2066_v40 = vsel %vm2062_vm7, %v2033_v31, %v1553_v8 }
 0x138   : > { %932 = vrot.lane.b32.xlu0 %v819_v63, %s3044_s30  ;;  %v1935_v63 = vsel %vm1930_vm3, %v1902_v62, %v3473_v0 }
 0x139   : > { %v3481_v6 = vpop.permute.xlu1 %1170 }
 0x13a   : > { %v3485_v15 = vpop.permute.xlu0 %1172  ;;  %v1968_v1 = vsel %vm1963_vm4, %v1935_v63, %v3481_v6  ;;  %v3632_v63 = vld [vmem:[#allocation2 + $0xe0] sm:$0xff] }
 0x13b   : > { %1820 = vrot.lane.b32.xlu1 %v851_v11, %s3052_s16 }
 0x13c   : > { %1440 = vrot.lane.b32.xlu0 %v851_v11, %s3049_s13 }
 0x13d   : > { %v1679_v14 = vpop.permute.xlu1 %1678 }
 0x13e   : > { %v1681_v23 = vpop.permute.xlu0 %1680  ;;  %v2098_v10 = vsel %vm2095_vm8, %v2065_v27, %v1679_v14  ;;  %v3561_v14 = vld [vmem:[#allocation2 + $0xc0] sm:$0xff] }
 0x13f   : > { %1058 = vrot.lane.b32.xlu1 %v850_v2, %s3045_s7  ;;  %v2099_v19 = vsel %vm2095_vm8, %v2066_v40, %v1681_v23  ;;  %v855_v40 = vld [vmem:[#allocation2 + $0xca] sm:$0xff] }
 0x140   : > { %1060 = vrot.lane.b32.xlu0 %v851_v11, %s3045_s7 }
 0x141   : > { %v1299_v21 = vpop.permute.xlu1 %1298 }
 0x142   : > { %v3505_v29 = vpop.permute.xlu0 %918  ;;  %v2001_v8 = vsel %vm1996_vm5, %v1968_v1, %v1299_v21  ;;  %v1936_v21 = vsel %vm1930_vm3, %v1903_v20, %v3477_v5  ;;  %v825_v20 = vld [vmem:[#allocation2 + $0xe1] sm:$0xff] }
 0x143   : > { %1566 = vrot.lane.b32.xlu1 %v3498_v28, %s3050_s22  ;;  %v1969_v23 = vsel %vm1963_vm4, %v1936_v21, %v3485_v15 }
 0x144   : > { %1568 = vrot.lane.b32.xlu0 %v3508_v30, %s3050_s22 }
 0x145   : > { %v1807_v17 = vpop.permute.xlu1 %1806 }
 0x146   : > { %v2131_v22 = vsel %vm2128_vm9, %v2098_v10, %v1807_v17  ;;  %v1427_v37 = vpop.permute.xlu0 %1426 }
 0x147   : > { %2968 = vmatprep.mubr.msk.f32.mxu0 %vm2177_vm10, %v2131_v22  ;;  %1186 = vrot.lane.b32.xlu1 %v3498_v28, %s3047_s11  ;;  %v2034_v11 = vsel %vm2029_vm6, %v2001_v8, %v1427_v37 }
 0x148   : > { %1188 = vrot.lane.b32.xlu0 %v3508_v30, %s3047_s11 }
 0x149   : > { %v1301_v35 = vpop.permute.xlu1 %1300 }
 0x14a   : > { %v3529_v43 = vpop.permute.xlu0 %920  ;;  %v2002_v27 = vsel %vm1996_vm5, %v1969_v23, %v1301_v35  ;;  %v854_v35 = vld [vmem:[#allocation2 + $0xc2] sm:$0xff] }
 0x14b   : > { %1694 = vrot.lane.b32.xlu1 %v820_v12, %s3051_s8  ;;  %v1905_v1 = vsel %vm496_vm0, %v3344_v52, %v3529_v43  ;;  %v824_v43 = vld [vmem:[#allocation2 + $0xd9] sm:$0xff] }
 0x14c   : > { %1696 = vrot.lane.b32.xlu0 %v821_v45, %s3051_s8 }
 0x14d   : > { %v1809_v41 = vpop.permute.xlu1 %1808 }
 0x14e   : > { %v2132_v26 = vsel %vm2128_vm9, %v2099_v19, %v1809_v41  ;;  %v1429_v48 = vpop.permute.xlu0 %1428 }
 0x14f   : > { %2969 = vmatmul.mubr.msk.f32.gmra.mxu0 %vm2177_vm10, %v2132_v26  ;;  %1314 = vrot.lane.b32.xlu1 %v820_v12, %s3048_s12  ;;  %v2035_v42 = vsel %vm2029_vm6, %v2002_v27, %v1429_v48  ;;  %v1904_v26 = vsel %vm496_vm0, %v3339_v51, %v3505_v29 }
 0x150   : > { %934 = vrot.lane.b32.xlu0 %v820_v12, %s3044_s30 }
 0x151   : > { %v3535_v47 = vpop.permute.xlu1 %1046 }
 0x152   : > { %v3539_v50 = vpop.permute.xlu0 %1048 }
 0x153   : > { %1822 = vrot.lane.b32.xlu1 %v852_v49, %s3052_s16 }
 0x154   : > { %1442 = vrot.lane.b32.xlu0 %v852_v49, %s3049_s13 }
 0x155   : > { %v1555_v53 = vpop.permute.xlu1 %1554 }
 0x156   : > { %v1557_v54 = vpop.permute.xlu0 %1556  ;;  %v2067_v39 = vsel %vm2062_vm7, %v2034_v11, %v1555_v53 }
 0x157   : > { %1316 = vrot.lane.b32.xlu1 %v821_v45, %s3048_s12  ;;  %v2068_v10 = vsel %vm2062_vm7, %v2035_v42, %v1557_v54 }
 0x158   : > { %936 = vrot.lane.b32.xlu0 %v821_v45, %s3044_s30  ;;  %v1937_v45 = vsel %vm1930_vm3, %v1904_v26, %v3535_v47 }
 0x159   : > { %v3543_v55 = vpop.permute.xlu1 %1174 }
 0x15a   : > { %v3547_v59 = vpop.permute.xlu0 %1176  ;;  %v1970_v48 = vsel %vm1963_vm4, %v1937_v45, %v3543_v55 }
 0x15b   : > { %1824 = vrot.lane.b32.xlu1 %v853_v56, %s3052_s16 }
 0x15c   : > { %1444 = vrot.lane.b32.xlu0 %v853_v56, %s3049_s13 }
 0x15d   : > { %v1683_v60 = vpop.permute.xlu1 %1682 }
 0x15e   : > { %v1685_v2 = vpop.permute.xlu0 %1684  ;;  %v2100_v44 = vsel %vm2095_vm8, %v2067_v39, %v1683_v60  ;;  %v3622_v60 = vld [vmem:[#allocation2 + $0xd8] sm:$0xff] }
 0x15f   : > { %1062 = vrot.lane.b32.xlu1 %v852_v49, %s3045_s7  ;;  %v2101_v5 = vsel %vm2095_vm8, %v2068_v10, %v1685_v2  ;;  %v1938_v2 = vsel %vm1930_vm3, %v1905_v1, %v3539_v50  ;;  %v857_v10 = vld [vmem:[#allocation2 + $0xe2] sm:$0xff]  ;;  %v827_v1 = vld [vmem:[#allocation2 + $0xf9] sm:$0xff] }
 0x160   : > { %1064 = vrot.lane.b32.xlu0 %v853_v56, %s3045_s7 }
 0x161   : > { %v1303_v3 = vpop.permute.xlu1 %1302 }
 0x162   : > { %v3567_v16 = vpop.permute.xlu0 %922  ;;  %v2003_v54 = vsel %vm1996_vm5, %v1970_v48, %v1303_v3  ;;  %v1971_v3 = vsel %vm1963_vm4, %v1938_v2, %v3547_v59 }
 0x163   : > { %1570 = vrot.lane.b32.xlu1 %v3561_v14, %s3050_s22 }
 0x164   : > { %1572 = vrot.lane.b32.xlu0 %v3570_v18, %s3050_s22 }
 0x165   : > { %v1811_v0 = vpop.permute.xlu1 %1810 }
 0x166   : > { %v2133_v6 = vsel %vm2128_vm9, %v2100_v44, %v1811_v0  ;;  %v1431_v25 = vpop.permute.xlu0 %1430 }
 0x167   : > { %2971 = vmatprep.mubr.msk.f32.mxu0 %vm2177_vm10, %v2133_v6  ;;  %1190 = vrot.lane.b32.xlu1 %v3561_v14, %s3047_s11  ;;  %v2036_v56 = vsel %vm2029_vm6, %v2003_v54, %v1431_v25 }
 0x168   : > { %1192 = vrot.lane.b32.xlu0 %v3570_v18, %s3047_s11 }
 0x169   : > { %v1305_v24 = vpop.permute.xlu1 %1304 }
 0x16a   : > { %v3591_v22 = vpop.permute.xlu0 %924  ;;  %v2004_v39 = vsel %vm1996_vm5, %v1971_v3, %v1305_v24  ;;  %v856_v24 = vld [vmem:[#allocation2 + $0xda] sm:$0xff] }
 0x16b   : > { %1698 = vrot.lane.b32.xlu1 %v822_v61, %s3051_s8  ;;  %v1907_v48 = vsel %vm496_vm0, %v3368_v58, %v3591_v22 }
 0x16c   : > { %1700 = vrot.lane.b32.xlu0 %v823_v32, %s3051_s8 }
 0x16d   : > { %v1813_v17 = vpop.permute.xlu1 %1812 }
 0x16e   : > { %v2134_v15 = vsel %vm2128_vm9, %v2101_v5, %v1813_v17  ;;  %v1433_v34 = vpop.permute.xlu0 %1432 }
 0x16f   : > { %2972 = vmatmul.mubr.msk.f32.gmra.mxu0 %vm2177_vm10, %v2134_v15  ;;  %1318 = vrot.lane.b32.xlu1 %v822_v61, %s3048_s12  ;;  %v2037_v52 = vsel %vm2029_vm6, %v2004_v39, %v1433_v34  ;;  %v1906_v15 = vsel %vm496_vm0, %v3363_v57, %v3567_v16 }
 0x170   : > { %938 = vrot.lane.b32.xlu0 %v822_v61, %s3044_s30 }
 0x171   : > { %v3597_v33 = vpop.permute.xlu1 %1050 }
 0x172   : > { %v3601_v37 = vpop.permute.xlu0 %1052 }
 0x173   : > { %1826 = vrot.lane.b32.xlu1 %v854_v35, %s3052_s16 }
 0x174   : > { %1446 = vrot.lane.b32.xlu0 %v854_v35, %s3049_s13 }
 0x175   : > { %v1559_v38 = vpop.permute.xlu1 %1558 }
 0x176   : > { %v1561_v31 = vpop.permute.xlu0 %1560  ;;  %v2069_v51 = vsel %vm2062_vm7, %v2036_v56, %v1559_v38 }
 0x177   : > { %1320 = vrot.lane.b32.xlu1 %v823_v32, %s3048_s12  ;;  %v2070_v44 = vsel %vm2062_vm7, %v2037_v52, %v1561_v31 }
 0x178   : > { %940 = vrot.lane.b32.xlu0 %v823_v32, %s3044_s30  ;;  %v1939_v32 = vsel %vm1930_vm3, %v1906_v15, %v3597_v33 }
 0x179   : > { %v3605_v12 = vpop.permute.xlu1 %1178 }
 0x17a   : > { %v3609_v19 = vpop.permute.xlu0 %1180 }
 0x17b   : > { %1828 = vrot.lane.b32.xlu1 %v855_v40, %s3052_s16 }
 0x17c   : > { %1448 = vrot.lane.b32.xlu0 %v855_v40, %s3049_s13 }
 0x17d   : > { %v1687_v41 = vpop.permute.xlu1 %1686 }
 0x17e   : > { %v1689_v49 = vpop.permute.xlu0 %1688  ;;  %v2102_v29 = vsel %vm2095_vm8, %v2069_v51, %v1687_v41 }
 0x17f   : > { %1066 = vrot.lane.b32.xlu1 %v854_v35, %s3045_s7  ;;  %v2103_v50 = vsel %vm2095_vm8, %v2070_v44, %v1689_v49  ;;  %v1972_v35 = vsel %vm1963_vm4, %v1939_v32, %v3605_v12  ;;  %v3693_v12 = vld [vmem:[#allocation2 + $0xf8] sm:$0xff]  ;;  %v1940_v49 = vsel %vm1930_vm3, %v1907_v48, %v3601_v37 }
 0x180   : > { %1068 = vrot.lane.b32.xlu0 %v855_v40, %s3045_s7  ;;  %v3683_v40 = vld [vmem:[#allocation2 + $0xf0] sm:$0xff]  ;;  %v1973_v54 = vsel %vm1963_vm4, %v1940_v49, %v3609_v19  ;;  %v859_v44 = vld [vmem:[#allocation2 + $0xfa] sm:$0xff] }
 0x181   : > { %v1307_v53 = vpop.permute.xlu1 %1306  ;;  %v829_v48 = vld [vmem:[#allocation2 + $0x111] sm:$0xff] }
 0x182   : > { %v3629_v62 = vpop.permute.xlu0 %926  ;;  %v2005_v31 = vsel %vm1996_vm5, %v1972_v35, %v1307_v53 }
 0x183   : > { %1574 = vrot.lane.b32.xlu1 %v3622_v60, %s3050_s22 }
 0x184   : > { %1576 = vrot.lane.b32.xlu0 %v3632_v63, %s3050_s22 }
 0x185   : > { %v1815_v47 = vpop.permute.xlu1 %1814 }
 0x186   : > { %v2135_v55 = vsel %vm2128_vm9, %v2102_v29, %v1815_v47  ;;  %v1435_v11 = vpop.permute.xlu0 %1434  ;;  %v826_v29 = vld [vmem:[#allocation2 + $0xf1] sm:$0xff] }
 0x187   : > { %2974 = vmatprep.mubr.msk.f32.mxu0 %vm2177_vm10, %v2135_v55  ;;  %1194 = vrot.lane.b32.xlu1 %v3622_v60, %s3047_s11  ;;  %v2038_v41 = vsel %vm2029_vm6, %v2005_v31, %v1435_v11 }
 0x188   : > { %1196 = vrot.lane.b32.xlu0 %v3632_v63, %s3047_s11 }
 0x189   : > { %v1309_v8 = vpop.permute.xlu1 %1308 }
 0x18a   : > { %v3653_v6 = vpop.permute.xlu0 %928  ;;  %v2006_v51 = vsel %vm1996_vm5, %v1973_v54, %v1309_v8  ;;  %v858_v8 = vld [vmem:[#allocation2 + $0xf2] sm:$0xff]  ;;  %v860_v54 = vld [vmem:[#allocation2 + $0x10a] sm:$0xff] }
 0x18b   : > { %1702 = vrot.lane.b32.xlu1 %v824_v43, %s3051_s8 }
 0x18c   : > { %1704 = vrot.lane.b32.xlu0 %v825_v20, %s3051_s8 }
 0x18d   : > { %v1817_v0 = vpop.permute.xlu1 %1816 }
 0x18e   : > { %v2136_v59 = vsel %vm2128_vm9, %v2103_v50, %v1817_v0  ;;  %v1437_v23 = vpop.permute.xlu0 %1436 }
 0x18f   : > { %2975 = vmatmul.mubr.msk.f32.gmra.mxu0 %vm2177_vm10, %v2136_v59  ;;  %1322 = vrot.lane.b32.xlu1 %v824_v43, %s3048_s12  ;;  %v2039_v58 = vsel %vm2029_vm6, %v2006_v51, %v1437_v23  ;;  %v1908_v59 = vsel %vm496_vm0, %v3391_v4, %v3629_v62 }
 0x190   : > { %942 = vrot.lane.b32.xlu0 %v824_v43, %s3044_s30 }
 0x191   : > { %v3659_v21 = vpop.permute.xlu1 %1054 }
 0x192   : > { %v3663_v25 = vpop.permute.xlu0 %1056 }
 0x193   : > { %1830 = vrot.lane.b32.xlu1 %v856_v24, %s3052_s16 }
 0x194   : > { %1450 = vrot.lane.b32.xlu0 %v856_v24, %s3049_s13 }
 0x195   : > { %v1563_v27 = vpop.permute.xlu1 %1562 }
 0x196   : > { %v1565_v42 = vpop.permute.xlu0 %1564  ;;  %v2071_v57 = vsel %vm2062_vm7, %v2038_v41, %v1563_v27 }
 0x197   : > { %1324 = vrot.lane.b32.xlu1 %v825_v20, %s3048_s12  ;;  %v2072_v22 = vsel %vm2062_vm7, %v2039_v58, %v1565_v42 }
 0x198   : > { %944 = vrot.lane.b32.xlu0 %v825_v20, %s3044_s30  ;;  %v1941_v20 = vsel %vm1930_vm3, %v1908_v59, %v3659_v21 }
 0x199   : > { %v3667_v61 = vpop.permute.xlu1 %1182 }
 0x19a   : > { %v3671_v5 = vpop.permute.xlu0 %1184 }
 0x19b   : > { %1832 = vrot.lane.b32.xlu1 %v857_v10, %s3052_s16 }
 0x19c   : > { %1452 = vrot.lane.b32.xlu0 %v857_v10, %s3049_s13 }
 0x19d   : > { %v1691_v17 = vpop.permute.xlu1 %1690 }
 0x19e   : > { %v1693_v34 = vpop.permute.xlu0 %1692  ;;  %v2104_v33 = vsel %vm2095_vm8, %v2071_v57, %v1691_v17 }
 0x19f   : > { %1070 = vrot.lane.b32.xlu1 %v856_v24, %s3045_s7  ;;  %v2105_v37 = vsel %vm2095_vm8, %v2072_v22, %v1693_v34  ;;  %v1974_v24 = vsel %vm1963_vm4, %v1941_v20, %v3667_v61  ;;  %v3755_v61 = vld [vmem:[#allocation2 + $0x110] sm:$0xff]  ;;  %v1909_v34 = vsel %vm496_vm0, %v3398_v7, %v3653_v6 }
 0x1a0   : > { %1072 = vrot.lane.b32.xlu0 %v857_v10, %s3045_s7  ;;  %v3745_v10 = vld [vmem:[#allocation2 + $0x108] sm:$0xff]  ;;  %v1942_v35 = vsel %vm1930_vm3, %v1909_v34, %v3663_v25  ;;  %v861_v22 = vld [vmem:[#allocation2 + $0x112] sm:$0xff] }
 0x1a1   : > { %v1311_v38 = vpop.permute.xlu1 %1310  ;;  %v1975_v31 = vsel %vm1963_vm4, %v1942_v35, %v3671_v5  ;;  %v831_v34 = vld [vmem:[#allocation2 + $0x129] sm:$0xff] }
 0x1a2   : > { %v3690_v16 = vpop.permute.xlu0 %930  ;;  %v2007_v42 = vsel %vm1996_vm5, %v1974_v24, %v1311_v38 }
 0x1a3   : > { %1578 = vrot.lane.b32.xlu1 %v3683_v40, %s3050_s22 }
 0x1a4   : > { %1580 = vrot.lane.b32.xlu0 %v3693_v12, %s3050_s22 }
 0x1a5   : > { %v1819_v26 = vpop.permute.xlu1 %1818 }
 0x1a6   : > { %v2137_v45 = vsel %vm2128_vm9, %v2104_v33, %v1819_v26  ;;  %v1439_v53 = vpop.permute.xlu0 %1438  ;;  %v828_v33 = vld [vmem:[#allocation2 + $0x109] sm:$0xff] }
 0x1a7   : > { %2977 = vmatprep.mubr.msk.f32.mxu0 %vm2177_vm10, %v2137_v45  ;;  %1198 = vrot.lane.b32.xlu1 %v3683_v40, %s3047_s11  ;;  %v2040_v17 = vsel %vm2029_vm6, %v2007_v42, %v1439_v53 }
 0x1a8   : > { %1200 = vrot.lane.b32.xlu0 %v3693_v12, %s3047_s11 }
 0x1a9   : > { %v1313_v56 = vpop.permute.xlu1 %1312 }
 0x1aa   : > { %v3714_v47 = vpop.permute.xlu0 %932  ;;  %v2008_v57 = vsel %vm1996_vm5, %v1975_v31, %v1313_v56  ;;  %v862_v31 = vld [vmem:[#allocation2 + $0x122] sm:$0xff] }
 0x1ab   : > { %1706 = vrot.lane.b32.xlu1 %v826_v29, %s3051_s8 }
 0x1ac   : > { %1708 = vrot.lane.b32.xlu0 %v827_v1, %s3051_s8 }
 0x1ad   : > { %v1821_v55 = vpop.permute.xlu1 %1820 }
 0x1ae   : > { %v2138_v19 = vsel %vm2128_vm9, %v2105_v37, %v1821_v55  ;;  %v1441_v2 = vpop.permute.xlu0 %1440 }
 0x1af   : > { %2978 = vmatmul.mubr.msk.f32.gmra.mxu0 %vm2177_vm10, %v2138_v19  ;;  %1326 = vrot.lane.b32.xlu1 %v826_v29, %s3048_s12  ;;  %v2041_v7 = vsel %vm2029_vm6, %v2008_v57, %v1441_v2 }
 0x1b0   : > { %946 = vrot.lane.b32.xlu0 %v826_v29, %s3044_s30 }
 0x1b1   : > { %v3721_v3 = vpop.permute.xlu1 %1058 }
 0x1b2   : > { %v3725_v11 = vpop.permute.xlu0 %1060 }
 0x1b3   : > { %1834 = vrot.lane.b32.xlu1 %v858_v8, %s3052_s16 }
 0x1b4   : > { %1454 = vrot.lane.b32.xlu0 %v858_v8, %s3049_s13 }
 0x1b5   : > { %v1567_v39 = vpop.permute.xlu1 %1566 }
 0x1b6   : > { %v1569_v52 = vpop.permute.xlu0 %1568  ;;  %v2073_v4 = vsel %vm2062_vm7, %v2040_v17, %v1567_v39 }
 0x1b7   : > { %1328 = vrot.lane.b32.xlu1 %v827_v1, %s3048_s12  ;;  %v2074_v6 = vsel %vm2062_vm7, %v2041_v7, %v1569_v52 }
 0x1b8   : > { %948 = vrot.lane.b32.xlu0 %v827_v1, %s3044_s30  ;;  %v1910_v1 = vsel %vm496_vm0, %v3435_v36, %v3690_v16 }
 0x1b9   : > { %v3729_v43 = vpop.permute.xlu1 %1186  ;;  %v1943_v19 = vsel %vm1930_vm3, %v1910_v1, %v3721_v3 }
 0x1ba   : > { %v3733_v50 = vpop.permute.xlu0 %1188 }
 0x1bb   : > { %1836 = vrot.lane.b32.xlu1 %v859_v44, %s3052_s16 }
 0x1bc   : > { %1456 = vrot.lane.b32.xlu0 %v859_v44, %s3049_s13 }
 0x1bd   : > { %v1695_v0 = vpop.permute.xlu1 %1694 }
 0x1be   : > { %v1697_v23 = vpop.permute.xlu0 %1696  ;;  %v2106_v21 = vsel %vm2095_vm8, %v2073_v4, %v1695_v0 }
 0x1bf   : > { %1074 = vrot.lane.b32.xlu1 %v858_v8, %s3045_s7  ;;  %v2107_v25 = vsel %vm2095_vm8, %v2074_v6, %v1697_v23  ;;  %v1976_v8 = vsel %vm1963_vm4, %v1943_v19, %v3729_v43  ;;  %v3817_v43 = vld [vmem:[#allocation2 + $0x128] sm:$0xff]  ;;  %v1911_v23 = vsel %vm496_vm0, %v3448_v46, %v3714_v47 }
 0x1c0   : > { %1076 = vrot.lane.b32.xlu0 %v859_v44, %s3045_s7  ;;  %v3807_v44 = vld [vmem:[#allocation2 + $0x120] sm:$0xff]  ;;  %v1944_v24 = vsel %vm1930_vm3, %v1911_v23, %v3725_v11  ;;  %v863_v6 = vld [vmem:[#allocation2 + $0x12a] sm:$0xff] }
 0x1c1   : > { %v1315_v27 = vpop.permute.xlu1 %1314  ;;  %v1977_v42 = vsel %vm1963_vm4, %v1944_v24, %v3733_v50  ;;  %v833_v23 = vld [vmem:[#allocation2 + $0x141] sm:$0xff] }
 0x1c2   : > { %v3752_v62 = vpop.permute.xlu0 %934  ;;  %v2009_v52 = vsel %vm1996_vm5, %v1976_v8, %v1315_v27 }
 0x1c3   : > { %1582 = vrot.lane.b32.xlu1 %v3745_v10, %s3050_s22 }
 0x1c4   : > { %1584 = vrot.lane.b32.xlu0 %v3755_v61, %s3050_s22 }
 0x1c5   : > { %v1823_v15 = vpop.permute.xlu1 %1822 }
 0x1c6   : > { %v2139_v32 = vsel %vm2128_vm9, %v2106_v21, %v1823_v15  ;;  %v1443_v38 = vpop.permute.xlu0 %1442  ;;  %v830_v21 = vld [vmem:[#allocation2 + $0x121] sm:$0xff] }
 0x1c7   : > { %2980 = vmatprep.mubr.msk.f32.mxu0 %vm2177_vm10, %v2139_v32  ;;  %1202 = vrot.lane.b32.xlu1 %v3745_v10, %s3047_s11  ;;  %v2042_v0 = vsel %vm2029_vm6, %v2009_v52, %v1443_v38 }
 0x1c8   : > { %1204 = vrot.lane.b32.xlu0 %v3755_v61, %s3047_s11 }
 0x1c9   : > { %v1317_v41 = vpop.permute.xlu1 %1316 }
 0x1ca   : > { %v3776_v26 = vpop.permute.xlu0 %936  ;;  %v2010_v4 = vsel %vm1996_vm5, %v1977_v42, %v1317_v41  ;;  %v864_v42 = vld [vmem:[#allocation2 + $0x13a] sm:$0xff] }
 0x1cb   : > { %1710 = vrot.lane.b32.xlu1 %v828_v33, %s3051_s8 }
 0x1cc   : > { %1712 = vrot.lane.b32.xlu0 %v829_v48, %s3051_s8 }
 0x1cd   : > { %v1825_v45 = vpop.permute.xlu1 %1824 }
 0x1ce   : > { %v2140_v5 = vsel %vm2128_vm9, %v2107_v25, %v1825_v45  ;;  %v1445_v49 = vpop.permute.xlu0 %1444 }
 0x1cf   : > { %2981 = vmatmul.mubr.msk.f32.gmra.mxu0 %vm2177_vm10, %v2140_v5  ;;  %1330 = vrot.lane.b32.xlu1 %v828_v33, %s3048_s12  ;;  %v2043_v46 = vsel %vm2029_vm6, %v2010_v4, %v1445_v49 }
 0x1d0   : > { %950 = vrot.lane.b32.xlu0 %v828_v33, %s3044_s30 }
 0x1d1   : > { %v3783_v53 = vpop.permute.xlu1 %1062 }
 0x1d2   : > { %v3787_v56 = vpop.permute.xlu0 %1064 }
 0x1d3   : > { %1838 = vrot.lane.b32.xlu1 %v860_v54, %s3052_s16 }
 0x1d4   : > { %1458 = vrot.lane.b32.xlu0 %v860_v54, %s3049_s13 }
 0x1d5   : > { %v1571_v51 = vpop.permute.xlu1 %1570 }
 0x1d6   : > { %v1573_v29 = vpop.permute.xlu0 %1572  ;;  %v2075_v36 = vsel %vm2062_vm7, %v2042_v0, %v1571_v51 }
 0x1d7   : > { %1332 = vrot.lane.b32.xlu1 %v829_v48, %s3048_s12  ;;  %v2076_v47 = vsel %vm2062_vm7, %v2043_v46, %v1573_v29 }
 0x1d8   : > { %952 = vrot.lane.b32.xlu0 %v829_v48, %s3044_s30  ;;  %v1912_v48 = vsel %vm496_vm0, %v3498_v28, %v3752_v62 }
 0x1d9   : > { %v3791_v58 = vpop.permute.xlu1 %1190  ;;  %v1945_v5 = vsel %vm1930_vm3, %v1912_v48, %v3783_v53 }
 0x1da   : > { %v3795_v37 = vpop.permute.xlu0 %1192 }
 0x1db   : > { %1840 = vrot.lane.b32.xlu1 %v861_v22, %s3052_s16 }
 0x1dc   : > { %1460 = vrot.lane.b32.xlu0 %v861_v22, %s3049_s13 }
 0x1dd   : > { %v1699_v55 = vpop.permute.xlu1 %1698 }
 0x1de   : > { %v1701_v2 = vpop.permute.xlu0 %1700  ;;  %v2108_v3 = vsel %vm2095_vm8, %v2075_v36, %v1699_v55 }
 0x1df   : > { %1078 = vrot.lane.b32.xlu1 %v860_v54, %s3045_s7  ;;  %v2109_v11 = vsel %vm2095_vm8, %v2076_v47, %v1701_v2  ;;  %v1978_v54 = vsel %vm1963_vm4, %v1945_v5, %v3791_v58  ;;  %v3879_v58 = vld [vmem:[#allocation2 + $0x140] sm:$0xff]  ;;  %v1913_v2 = vsel %vm496_vm0, %v3508_v30, %v3776_v26 }
 0x1e0   : > { %1080 = vrot.lane.b32.xlu0 %v861_v22, %s3045_s7  ;;  %v3869_v22 = vld [vmem:[#allocation2 + $0x138] sm:$0xff]  ;;  %v1946_v8 = vsel %vm1930_vm3, %v1913_v2, %v3787_v56  ;;  %v865_v47 = vld [vmem:[#allocation2 + $0x142] sm:$0xff] }
 0x1e1   : > { %v1319_v39 = vpop.permute.xlu1 %1318  ;;  %v1979_v52 = vsel %vm1963_vm4, %v1946_v8, %v3795_v37  ;;  %v835_v2 = vld [vmem:[#allocation2 + $0x159] sm:$0xff] }
 0x1e2   : > { %v3814_v16 = vpop.permute.xlu0 %938  ;;  %v2011_v29 = vsel %vm1996_vm5, %v1978_v54, %v1319_v39 }
 0x1e3   : > { %1586 = vrot.lane.b32.xlu1 %v3807_v44, %s3050_s22 }
 0x1e4   : > { %1588 = vrot.lane.b32.xlu0 %v3817_v43, %s3050_s22 }
 0x1e5   : > { %v1827_v59 = vpop.permute.xlu1 %1826 }
 0x1e6   : > { %v2141_v20 = vsel %vm2128_vm9, %v2108_v3, %v1827_v59  ;;  %v1447_v27 = vpop.permute.xlu0 %1446  ;;  %v832_v3 = vld [vmem:[#allocation2 + $0x139] sm:$0xff] }
 0x1e7   : > { %2983 = vmatprep.mubr.msk.f32.mxu0 %vm2177_vm10, %v2141_v20  ;;  %1206 = vrot.lane.b32.xlu1 %v3807_v44, %s3047_s11  ;;  %v2044_v55 = vsel %vm2029_vm6, %v2011_v29, %v1447_v27 }
 0x1e8   : > { %1208 = vrot.lane.b32.xlu0 %v3817_v43, %s3047_s11 }
 0x1e9   : > { %v1321_v17 = vpop.permute.xlu1 %1320 }
 0x1ea   : > { %v3838_v15 = vpop.permute.xlu0 %940  ;;  %v2012_v36 = vsel %vm1996_vm5, %v1979_v52, %v1321_v17  ;;  %v866_v52 = vld [vmem:[#allocation2 + $0x152] sm:$0xff] }
 0x1eb   : > { %1714 = vrot.lane.b32.xlu1 %v830_v21, %s3051_s8 }
 0x1ec   : > { %1716 = vrot.lane.b32.xlu0 %v831_v34, %s3051_s8 }
 0x1ed   : > { %v1829_v32 = vpop.permute.xlu1 %1828 }
 0x1ee   : > { %v2142_v50 = vsel %vm2128_vm9, %v2109_v11, %v1829_v32  ;;  %v1449_v35 = vpop.permute.xlu0 %1448 }
 0x1ef   : > { %2984 = vmatmul.mubr.msk.f32.gmra.mxu0 %vm2177_vm10, %v2142_v50  ;;  %1334 = vrot.lane.b32.xlu1 %v830_v21, %s3048_s12  ;;  %v2045_v30 = vsel %vm2029_vm6, %v2012_v36, %v1449_v35 }
 0x1f0   : > { %954 = vrot.lane.b32.xlu0 %v830_v21, %s3044_s30 }
 0x1f1   : > { %v3845_v38 = vpop.permute.xlu1 %1066 }
 0x1f2   : > { %v3849_v41 = vpop.permute.xlu0 %1068 }
 0x1f3   : > { %1842 = vrot.lane.b32.xlu1 %v862_v31, %s3052_s16 }
 0x1f4   : > { %1462 = vrot.lane.b32.xlu0 %v862_v31, %s3049_s13 }
 0x1f5   : > { %v1575_v57 = vpop.permute.xlu1 %1574 }
 0x1f6   : > { %v1577_v33 = vpop.permute.xlu0 %1576  ;;  %v2077_v28 = vsel %vm2062_vm7, %v2044_v55, %v1575_v57 }
 0x1f7   : > { %1336 = vrot.lane.b32.xlu1 %v831_v34, %s3048_s12  ;;  %v2078_v26 = vsel %vm2062_vm7, %v2045_v30, %v1577_v33 }
 0x1f8   : > { %956 = vrot.lane.b32.xlu0 %v831_v34, %s3044_s30  ;;  %v1914_v34 = vsel %vm496_vm0, %v3561_v14, %v3814_v16 }
 0x1f9   : > { %v3853_v7 = vpop.permute.xlu1 %1194  ;;  %v1947_v50 = vsel %vm1930_vm3, %v1914_v34, %v3845_v38 }
 0x1fa   : > { %v3857_v25 = vpop.permute.xlu0 %1196 }
 0x1fb   : > { %1844 = vrot.lane.b32.xlu1 %v863_v6, %s3052_s16 }
 0x1fc   : > { %1464 = vrot.lane.b32.xlu0 %v863_v6, %s3049_s13 }
 0x1fd   : > { %v1703_v45 = vpop.permute.xlu1 %1702 }
 0x1fe   : > { %v1705_v49 = vpop.permute.xlu0 %1704  ;;  %v2110_v53 = vsel %vm2095_vm8, %v2077_v28, %v1703_v45 }
 0x1ff   : > { %1082 = vrot.lane.b32.xlu1 %v862_v31, %s3045_s7  ;;  %v2111_v56 = vsel %vm2095_vm8, %v2078_v26, %v1705_v49  ;;  %v1980_v31 = vsel %vm1963_vm4, %v1947_v50, %v3853_v7  ;;  %v3941_v7 = vld [vmem:[#allocation2 + $0x158] sm:$0xff]  ;;  %v1915_v49 = vsel %vm496_vm0, %v3570_v18, %v3838_v15 }
 0x200   : > { %1084 = vrot.lane.b32.xlu0 %v863_v6, %s3045_s7  ;;  %v3931_v6 = vld [vmem:[#allocation2 + $0x150] sm:$0xff]  ;;  %v1948_v54 = vsel %vm1930_vm3, %v1915_v49, %v3849_v41  ;;  %v867_v26 = vld [vmem:[#allocation2 + $0x15a] sm:$0xff] }
 0x201   : > { %v1323_v51 = vpop.permute.xlu1 %1322  ;;  %v1981_v29 = vsel %vm1963_vm4, %v1948_v54, %v3857_v25  ;;  %v837_v49 = vld [vmem:[#allocation2 + $0x171] sm:$0xff] }
 0x202   : > { %v3876_v62 = vpop.permute.xlu0 %942  ;;  %v2013_v33 = vsel %vm1996_vm5, %v1980_v31, %v1323_v51 }
 0x203   : > { %1590 = vrot.lane.b32.xlu1 %v3869_v22, %s3050_s22 }
 0x204   : > { %1592 = vrot.lane.b32.xlu0 %v3879_v58, %s3050_s22 }
 0x205   : > { %v1831_v1 = vpop.permute.xlu1 %1830 }
 0x206   : > { %v2143_v19 = vsel %vm2128_vm9, %v2110_v53, %v1831_v1  ;;  %v1451_v39 = vpop.permute.xlu0 %1450  ;;  %v834_v53 = vld [vmem:[#allocation2 + $0x151] sm:$0xff] }
 0x207   : > { %1210 = vrot.lane.b32.xlu1 %v3869_v22, %s3047_s11  ;;  %2986 = vmatprep.mubr.msk.f32.mxu0 %vm2177_vm10, %v2143_v19  ;;  %v2046_v45 = vsel %vm2029_vm6, %v2013_v33, %v1451_v39 }
 0x208   : > { %1212 = vrot.lane.b32.xlu0 %v3879_v58, %s3047_s11 }
 0x209   : > { %v1325_v0 = vpop.permute.xlu1 %1324 }
 0x20a   : > { %v3900_v59 = vpop.permute.xlu0 %944  ;;  %v2014_v28 = vsel %vm1996_vm5, %v1981_v29, %v1325_v0  ;;  %v868_v29 = vld [vmem:[#allocation2 + $0x16a] sm:$0xff] }
 0x20b   : > { %1718 = vrot.lane.b32.xlu1 %v832_v3, %s3051_s8 }
 0x20c   : > { %1720 = vrot.lane.b32.xlu0 %v833_v23, %s3051_s8 }
 0x20d   : > { %v1833_v20 = vpop.permute.xlu1 %1832 }
 0x20e   : > { %v2144_v37 = vsel %vm2128_vm9, %v2111_v56, %v1833_v20  ;;  %v1453_v24 = vpop.permute.xlu0 %1452 }
 0x20f   : > { %1338 = vrot.lane.b32.xlu1 %v832_v3, %s3048_s12  ;;  %2987 = vmatmul.mubr.msk.f32.gmra.mxu0 %vm2177_vm10, %v2144_v37  ;;  %v2047_v18 = vsel %vm2029_vm6, %v2014_v28, %v1453_v24 }
 0x210   : > { %958 = vrot.lane.b32.xlu0 %v832_v3, %s3044_s30 }
 0x211   : > { %v3907_v27 = vpop.permute.xlu1 %1070 }
 0x212   : > { %v3911_v17 = vpop.permute.xlu0 %1072 }
 0x213   : > { %1846 = vrot.lane.b32.xlu1 %v864_v42, %s3052_s16 }
 0x214   : > { %1466 = vrot.lane.b32.xlu0 %v864_v42, %s3049_s13 }
 0x215   : > { %v1579_v4 = vpop.permute.xlu1 %1578 }
 0x216   : > { %v1581_v21 = vpop.permute.xlu0 %1580  ;;  %v2079_v14 = vsel %vm2062_vm7, %v2046_v45, %v1579_v4 }
 0x217   : > { %1340 = vrot.lane.b32.xlu1 %v833_v23, %s3048_s12  ;;  %v2080_v15 = vsel %vm2062_vm7, %v2047_v18, %v1581_v21 }
 0x218   : > { %960 = vrot.lane.b32.xlu0 %v833_v23, %s3044_s30  ;;  %v1916_v23 = vsel %vm496_vm0, %v3622_v60, %v3876_v62 }
 0x219   : > { %v3915_v46 = vpop.permute.xlu1 %1198  ;;  %v1949_v37 = vsel %vm1930_vm3, %v1916_v23, %v3907_v27 }
 0x21a   : > { %v3919_v11 = vpop.permute.xlu0 %1200 }
 0x21b   : > { %1848 = vrot.lane.b32.xlu1 %v865_v47, %s3052_s16 }
 0x21c   : > { %1468 = vrot.lane.b32.xlu0 %v865_v47, %s3049_s13 }
 0x21d   : > { %v1707_v32 = vpop.permute.xlu1 %1706 }
 0x21e   : > { %v1709_v35 = vpop.permute.xlu0 %1708  ;;  %v2112_v38 = vsel %vm2095_vm8, %v2079_v14, %v1707_v32 }
 0x21f   : > { %1086 = vrot.lane.b32.xlu1 %v864_v42, %s3045_s7  ;;  %v2113_v41 = vsel %vm2095_vm8, %v2080_v15, %v1709_v35  ;;  %v1982_v42 = vsel %vm1963_vm4, %v1949_v37, %v3915_v46  ;;  %v4003_v46 = vld [vmem:[#allocation2 + $0x170] sm:$0xff]  ;;  %v1917_v35 = vsel %vm496_vm0, %v3632_v63, %v3900_v59  ;;  %v807_v37 = vld [vmem:[#allocation2 + $0x188] sm:$0xff] }
 0x220   : > { %1088 = vrot.lane.b32.xlu0 %v865_v47, %s3045_s7  ;;  %v3993_v47 = vld [vmem:[#allocation2 + $0x168] sm:$0xff]  ;;  %v1950_v31 = vsel %vm1930_vm3, %v1917_v35, %v3911_v17  ;;  %v869_v15 = vld [vmem:[#allocation2 + $0x172] sm:$0xff] }
 0x221   : > { %v1327_v57 = vpop.permute.xlu1 %1326  ;;  %v1983_v33 = vsel %vm1963_vm4, %v1950_v31, %v3919_v11  ;;  %v839_v35 = vld [vmem:[#allocation2 + $0x189] sm:$0xff] }
 0x222   : > { %v3938_v16 = vpop.permute.xlu0 %946  ;;  %v2015_v21 = vsel %vm1996_vm5, %v1982_v42, %v1327_v57 }
 0x223   : > { %1594 = vrot.lane.b32.xlu1 %v3931_v6, %s3050_s22 }
 0x224   : > { %1596 = vrot.lane.b32.xlu0 %v3941_v7, %s3050_s22 }
 0x225   : > { %v1835_v48 = vpop.permute.xlu1 %1834 }
 0x226   : > { %v2145_v5 = vsel %vm2128_vm9, %v2112_v38, %v1835_v48  ;;  %v1455_v51 = vpop.permute.xlu0 %1454  ;;  %v836_v38 = vld [vmem:[#allocation2 + $0x169] sm:$0xff] }
 0x227   : > { %1214 = vrot.lane.b32.xlu1 %v3931_v6, %s3047_s11  ;;  %2989 = vmatprep.mubr.msk.f32.mxu0 %vm2177_vm10, %v2145_v5  ;;  %v2048_v32 = vsel %vm2029_vm6, %v2015_v21, %v1455_v51 }
 0x228   : > { %1216 = vrot.lane.b32.xlu0 %v3941_v7, %s3047_s11 }
 0x229   : > { %v1329_v55 = vpop.permute.xlu1 %1328 }
 0x22a   : > { %v3962_v1 = vpop.permute.xlu0 %948  ;;  %v2016_v14 = vsel %vm1996_vm5, %v1983_v33, %v1329_v55  ;;  %v870_v33 = vld [vmem:[#allocation2 + $0x182] sm:$0xff] }
 0x22b   : > { %1722 = vrot.lane.b32.xlu1 %v834_v53, %s3051_s8 }
 0x22c   : > { %1724 = vrot.lane.b32.xlu0 %v835_v2, %s3051_s8 }
 0x22d   : > { %v1837_v19 = vpop.permute.xlu1 %1836 }
 0x22e   : > { %v2146_v25 = vsel %vm2128_vm9, %v2113_v41, %v1837_v19  ;;  %v1457_v8 = vpop.permute.xlu0 %1456 }
 0x22f   : > { %1342 = vrot.lane.b32.xlu1 %v834_v53, %s3048_s12  ;;  %2990 = vmatmul.mubr.msk.f32.gmra.mxu0 %vm2177_vm10, %v2146_v25  ;;  %v2049_v63 = vsel %vm2029_vm6, %v2016_v14, %v1457_v8 }
 0x230   : > { %962 = vrot.lane.b32.xlu0 %v834_v53, %s3044_s30 }
 0x231   : > { %v3969_v39 = vpop.permute.xlu1 %1074 }
 0x232   : > { %v3973_v0 = vpop.permute.xlu0 %1076 }
 0x233   : > { %1850 = vrot.lane.b32.xlu1 %v866_v52, %s3052_s16 }
 0x234   : > { %1470 = vrot.lane.b32.xlu0 %v866_v52, %s3049_s13 }
 0x235   : > { %v1583_v36 = vpop.permute.xlu1 %1582 }
 0x236   : > { %v1585_v3 = vpop.permute.xlu0 %1584  ;;  %v2081_v60 = vsel %vm2062_vm7, %v2048_v32, %v1583_v36 }
 0x237   : > { %1344 = vrot.lane.b32.xlu1 %v835_v2, %s3048_s12  ;;  %v2082_v59 = vsel %vm2062_vm7, %v2049_v63, %v1585_v3  ;;  %v808_v63 = vld [vmem:[#allocation2 + $0x198] sm:$0xff] }
 0x238   : > { %964 = vrot.lane.b32.xlu0 %v835_v2, %s3044_s30  ;;  %v1918_v2 = vsel %vm496_vm0, %v3683_v40, %v3938_v16 }
 0x239   : > { %v3977_v30 = vpop.permute.xlu1 %1202  ;;  %v1951_v25 = vsel %vm1930_vm3, %v1918_v2, %v3969_v39 }
 0x23a   : > { %v3981_v56 = vpop.permute.xlu0 %1204 }
 0x23b   : > { %1852 = vrot.lane.b32.xlu1 %v867_v26, %s3052_s16 }
 0x23c   : > { %1472 = vrot.lane.b32.xlu0 %v867_v26, %s3049_s13 }
 0x23d   : > { %v1711_v20 = vpop.permute.xlu1 %1710 }
 0x23e   : > { %v1713_v24 = vpop.permute.xlu0 %1712  ;;  %v2114_v27 = vsel %vm2095_vm8, %v2081_v60, %v1711_v20 }
 0x23f   : > { %1090 = vrot.lane.b32.xlu1 %v866_v52, %s3045_s7  ;;  %v2115_v17 = vsel %vm2095_vm8, %v2082_v59, %v1713_v24  ;;  %v1984_v52 = vsel %vm1963_vm4, %v1951_v25, %v3977_v30  ;;  %v1919_v24 = vsel %vm496_vm0, %v3693_v12, %v3962_v1 }
 0x240   : > { %1092 = vrot.lane.b32.xlu0 %v867_v26, %s3045_s7  ;;  %v806_v26 = vld [vmem:[#allocation2 + $0x180] sm:$0xff]  ;;  %v1952_v42 = vsel %vm1930_vm3, %v1919_v24, %v3973_v0 }
 0x241   : > { %v1331_v4 = vpop.permute.xlu1 %1330  ;;  %v1985_v21 = vsel %vm1963_vm4, %v1952_v42, %v3981_v56 }
 0x242   : > { %v4000_v62 = vpop.permute.xlu0 %950  ;;  %v2017_v3 = vsel %vm1996_vm5, %v1984_v52, %v1331_v4 }
 0x243   : > { %1598 = vrot.lane.b32.xlu1 %v3993_v47, %s3050_s22 }
 0x244   : > { %1600 = vrot.lane.b32.xlu0 %v4003_v46, %s3050_s22 }
 0x245   : > { %v1839_v34 = vpop.permute.xlu1 %1838 }
 0x246   : > { %v2147_v50 = vsel %vm2128_vm9, %v2114_v27, %v1839_v34  ;;  %v1459_v57 = vpop.permute.xlu0 %1458  ;;  %v838_v27 = vld [vmem:[#allocation2 + $0x181] sm:$0xff] }
 0x247   : > { %1218 = vrot.lane.b32.xlu1 %v3993_v47, %s3047_s11  ;;  %2992 = vmatprep.mubr.msk.f32.mxu0 %vm2177_vm10, %v2147_v50  ;;  %v2050_v20 = vsel %vm2029_vm6, %v2017_v3, %v1459_v57 }
 0x248   : > { %1220 = vrot.lane.b32.xlu0 %v4003_v46, %s3047_s11 }
 0x249   : > { %v1333_v45 = vpop.permute.xlu1 %1332 }
 0x24a   : > { %v4024_v48 = vpop.permute.xlu0 %952  ;;  %v2018_v60 = vsel %vm1996_vm5, %v1985_v21, %v1333_v45 }
 0x24b   : > { %1726 = vrot.lane.b32.xlu1 %v836_v38, %s3051_s8 }
 0x24c   : > { %1728 = vrot.lane.b32.xlu0 %v837_v49, %s3051_s8 }
 0x24d   : > { %v1841_v5 = vpop.permute.xlu1 %1840 }
 0x24e   : > { %v2148_v11 = vsel %vm2128_vm9, %v2115_v17, %v1841_v5  ;;  %v1461_v54 = vpop.permute.xlu0 %1460  ;;  %v840_v5 = vld [vmem:[#allocation2 + $0x199] sm:$0xff] }
 0x24f   : > { %1346 = vrot.lane.b32.xlu1 %v836_v38, %s3048_s12  ;;  %2993 = vmatmul.mubr.msk.f32.gmra.mxu0 %vm2177_vm10, %v2148_v11  ;;  %v2051_v34 = vsel %vm2029_vm6, %v2018_v60, %v1461_v54  ;;  %v809_v11 = vld [vmem:[#allocation2 + $0x1a0] sm:$0xff] }
 0x250   : > { %966 = vrot.lane.b32.xlu0 %v836_v38, %s3044_s30  ;;  %v871_v38 = vld [vmem:[#allocation2 + $0x18a] sm:$0xff] }
 0x251   : > { %v4031_v51 = vpop.permute.xlu1 %1078 }
 0x252   : > { %v4035_v55 = vpop.permute.xlu0 %1080 }
 0x253   : > { %1854 = vrot.lane.b32.xlu1 %v868_v29, %s3052_s16 }
 0x254   : > { %1474 = vrot.lane.b32.xlu0 %v868_v29, %s3049_s13 }
 0x255   : > { %v1587_v28 = vpop.permute.xlu1 %1586 }
 0x256   : > { %v1589_v53 = vpop.permute.xlu0 %1588  ;;  %v2083_v40 = vsel %vm2062_vm7, %v2050_v20, %v1587_v28  ;;  %v872_v28 = vld [vmem:[#allocation2 + $0x19a] sm:$0xff] }
 0x257   : > { %1348 = vrot.lane.b32.xlu1 %v837_v49, %s3048_s12  ;;  %v2084_v12 = vsel %vm2062_vm7, %v2051_v34, %v1589_v53 }
 0x258   : > { %968 = vrot.lane.b32.xlu0 %v837_v49, %s3044_s30 }
 0x259   : > { %v4039_v18 = vpop.permute.xlu1 %1206 }
 0x25a   : > { %v4043_v41 = vpop.permute.xlu0 %1208 }
 0x25b   : > { %1856 = vrot.lane.b32.xlu1 %v869_v15, %s3052_s16 }
 0x25c   : > { %1476 = vrot.lane.b32.xlu0 %v869_v15, %s3049_s13 }
 0x25d   : > { %v1715_v19 = vpop.permute.xlu1 %1714 }
 0x25e   : > { %v1717_v8 = vpop.permute.xlu0 %1716  ;;  %v2116_v39 = vsel %vm2095_vm8, %v2083_v40, %v1715_v19  ;;  %v841_v19 = vld [vmem:[#allocation2 + $0x1a1] sm:$0xff] }
 0x25f   : > { %1094 = vrot.lane.b32.xlu1 %v868_v29, %s3045_s7  ;;  %v2117_v0 = vsel %vm2095_vm8, %v2084_v12, %v1717_v8  ;;  %v1920_v29 = vsel %vm496_vm0, %v3745_v10, %v4000_v62 }
 0x260   : > { %1096 = vrot.lane.b32.xlu0 %v869_v15, %s3045_s7  ;;  %v1953_v53 = vsel %vm1930_vm3, %v1920_v29, %v4031_v51  ;;  %v873_v51 = vld [vmem:[#allocation2 + $0x1a2] sm:$0xff] }
 0x261   : > { %v4054_v36 = vpop.permute.xlu1 %1334  ;;  %v1986_v2 = vsel %vm1963_vm4, %v1953_v53, %v4039_v18 }
 0x262   : > { %v4061_v16 = vpop.permute.xlu0 %954  ;;  %v2019_v8 = vsel %vm1996_vm5, %v1986_v2, %v4054_v36  ;;  %v1921_v36 = vsel %vm496_vm0, %v3755_v61, %v4024_v48 }
 0x263   : > { %1602 = vrot.lane.b32.xlu1 %v806_v26, %s3050_s22  ;;  %v1954_v20 = vsel %vm1930_vm3, %v1921_v36, %v4035_v55 }
 0x264   : > { %1604 = vrot.lane.b32.xlu0 %v807_v37, %s3050_s22 }
 0x265   : > { %v1843_v23 = vpop.permute.xlu1 %1842 }
 0x266   : > { %v2149_v30 = vsel %vm2128_vm9, %v2116_v39, %v1843_v23  ;;  %v1463_v4 = vpop.permute.xlu0 %1462  ;;  %v1987_v39 = vsel %vm1963_vm4, %v1954_v20, %v4043_v41 }
 0x267   : > { %1222 = vrot.lane.b32.xlu1 %v806_v26, %s3047_s11  ;;  %2995 = vmatprep.mubr.msk.f32.mxu0 %vm2177_vm10, %v2149_v30  ;;  %v2052_v52 = vsel %vm2029_vm6, %v2019_v8, %v1463_v4 }
 0x268   : > { %1224 = vrot.lane.b32.xlu0 %v807_v37, %s3047_s11 }
 0x269   : > { %v1337_v32 = vpop.permute.xlu1 %1336 }
 0x26a   : > { %v4080_v1 = vpop.permute.xlu0 %956  ;;  %v2020_v37 = vsel %vm1996_vm5, %v1987_v39, %v1337_v32 }
 0x26b   : > { %1730 = vrot.lane.b32.xlu1 %v838_v27, %s3051_s8 }
 0x26c   : > { %1732 = vrot.lane.b32.xlu0 %v839_v35, %s3051_s8 }
 0x26d   : > { %v1845_v50 = vpop.permute.xlu1 %1844 }
 0x26e   : > { %v2150_v56 = vsel %vm2128_vm9, %v2117_v0, %v1845_v50  ;;  %v1465_v31 = vpop.permute.xlu0 %1464  ;;  %v1922_v0 = vsel %vm496_vm0, %v3807_v44, %v4061_v16  ;;  %v1923_v44 = vsel %vm496_vm0, %v3817_v43, %v4080_v1 }
 0x26f   : > { %1350 = vrot.lane.b32.xlu1 %v838_v27, %s3048_s12  ;;  %2996 = vmatmul.mubr.msk.f32.gmra.mxu0 %vm2177_vm10, %v2150_v56  ;;  %v2053_v30 = vsel %vm2029_vm6, %v2020_v37, %v1465_v31 }
 0x270   : > { %1352 = vrot.lane.b32.xlu0 %v839_v35, %s3048_s12 }
 0x271   : > { %v1083_v57 = vpop.permute.xlu1 %1082 }
 0x272   : > { %v4089_v45 = vpop.permute.xlu0 %1084  ;;  %v1955_v50 = vsel %vm1930_vm3, %v1922_v0, %v1083_v57 }
 0x273   : > { %1858 = vrot.lane.b32.xlu1 %v870_v33, %s3052_s16  ;;  %v1956_v16 = vsel %vm1930_vm3, %v1923_v44, %v4089_v45 }
 0x274   : > { %1860 = vrot.lane.b32.xlu0 %v871_v38, %s3052_s16 }
 0x275   : > { %v1591_v14 = vpop.permute.xlu1 %1590 }
 0x276   : > { %v1593_v59 = vpop.permute.xlu0 %1592  ;;  %v2085_v10 = vsel %vm2062_vm7, %v2052_v52, %v1591_v14 }
 0x277   : > { %1478 = vrot.lane.b32.xlu1 %v870_v33, %s3049_s13  ;;  %v2086_v24 = vsel %vm2062_vm7, %v2053_v30, %v1593_v59 }
 0x278   : > { %1606 = vrot.lane.b32.xlu0 %v808_v63, %s3050_s22 }
 0x279   : > { %v1211_v17 = vpop.permute.xlu1 %1210 }
 0x27a   : > { %v1213_v49 = vpop.permute.xlu0 %1212  ;;  %v1988_v56 = vsel %vm1963_vm4, %v1955_v50, %v1211_v17 }
 0x27b   : > { %1480 = vrot.lane.b32.xlu1 %v871_v38, %s3049_s13  ;;  %v1989_v17 = vsel %vm1963_vm4, %v1956_v16, %v1213_v49  ;;  %s2532_s13 = sld [smem:[#allocation3]] }
 0x27c   : > { %1734 = vrot.lane.b32.xlu0 %v840_v5, %s3051_s8 }
 0x27d   : > { %v1719_v54 = vpop.permute.xlu1 %1718 }
 0x27e   : > { %v1721_v15 = vpop.permute.xlu0 %1720  ;;  %v2118_v3 = vsel %vm2095_vm8, %v2085_v10, %v1719_v54 }
 0x27f   : > { %1608 = vrot.lane.b32.xlu1 %v809_v11, %s3050_s22  ;;  %v2119_v61 = vsel %vm2095_vm8, %v2086_v24, %v1721_v15 }
 0x280   : > { %1862 = vrot.lane.b32.xlu0 %v872_v28, %s3052_s16 }
 0x281   : > { %v1339_v25 = vpop.permute.xlu1 %1338 }
 0x282   : > { %v4110_v62 = vpop.permute.xlu0 %958  ;;  %v2021_v33 = vsel %vm1996_vm5, %v1988_v56, %v1339_v25 }
 0x283   : > { %1736 = vrot.lane.b32.xlu1 %v841_v19, %s3051_s8 }
 0x285   : > { %v1847_v26 = vpop.permute.xlu1 %1846 }
 0x286   : > { %v2151_v18 = vsel %vm2128_vm9, %v2118_v3, %v1847_v26  ;;  %v1467_v40 = vpop.permute.xlu0 %1466  ;;  %v1924_v3 = vsel %vm496_vm0, %v3869_v22, %v4110_v62 }
 0x287   : > { %1864 = vrot.lane.b32.xlu1 %v873_v51, %s3052_s16  ;;  %2998 = vmatprep.mubr.msk.f32.mxu0 %vm2177_vm10, %v2151_v18  ;;  %v2054_v14 = vsel %vm2029_vm6, %v2021_v33, %v1467_v40 }
 0x289   : > { %v1341_v23 = vpop.permute.xlu1 %1340 }
 0x28a   : > { %v961_v42 = vpop.permute.xlu0 %960  ;;  %v2022_v29 = vsel %vm1996_vm5, %v1989_v17, %v1341_v23 }
 0x28b   : > { %v1925_v22 = vsel %vm496_vm0, %v3879_v58, %v961_v42 }
 0x28d   : > { %v1849_v48 = vpop.permute.xlu1 %1848 }
 0x28e   : > { %v2152_v4 = vsel %vm2128_vm9, %v2119_v61, %v1849_v48  ;;  %v1469_v55 = vpop.permute.xlu0 %1468 }
 0x28f   : > { %2999 = vmatmul.mubr.msk.f32.gmra.mxu0 %vm2177_vm10, %v2152_v4  ;;  %v2055_v28 = vsel %vm2029_vm6, %v2022_v29, %v1469_v55 }
 0x291   : > { %v1087_v21 = vpop.permute.xlu1 %1086 }
 0x292   : > { %v1089_v60 = vpop.permute.xlu0 %1088  ;;  %v1957_v26 = vsel %vm1930_vm3, %v1924_v3, %v1087_v21 }
 0x293   : > { %v1958_v62 = vsel %vm1930_vm3, %v1925_v22, %v1089_v60 }
 0x295   : > { %v1595_v27 = vpop.permute.xlu1 %1594 }
 0x296   : > { %v1597_v41 = vpop.permute.xlu0 %1596  ;;  %v2087_v38 = vsel %vm2062_vm7, %v2054_v14, %v1595_v27 }
 0x297   : > { %v2088_v53 = vsel %vm2062_vm7, %v2055_v28, %v1597_v41 }
 0x299   : > { %v1215_v34 = vpop.permute.xlu1 %1214 }
 0x29a   : > { %v1217_v12 = vpop.permute.xlu0 %1216  ;;  %v1990_v36 = vsel %vm1963_vm4, %v1957_v26, %v1215_v34 }
 0x29b   : > { %v1991_v4 = vsel %vm1963_vm4, %v1958_v62, %v1217_v12 }
 0x29d   : > { %v1723_v32 = vpop.permute.xlu1 %1722 }
 0x29e   : > { %v1725_v35 = vpop.permute.xlu0 %1724  ;;  %v2120_v59 = vsel %vm2095_vm8, %v2087_v38, %v1723_v32 }
 0x29f   : > { %v2121_v19 = vsel %vm2095_vm8, %v2088_v53, %v1725_v35 }
 0x2a1   : > { %v1343_v31 = vpop.permute.xlu1 %1342 }
 0x2a2   : > { %v963_v63 = vpop.permute.xlu0 %962  ;;  %v2023_v40 = vsel %vm1996_vm5, %v1990_v36, %v1343_v31 }
 0x2a3   : > { %v1926_v14 = vsel %vm496_vm0, %v3931_v6, %v963_v63 }
 0x2a5   : > { %v1851_v5 = vpop.permute.xlu1 %1850 }
 0x2a6   : > { %v2153_v11 = vsel %vm2128_vm9, %v2120_v59, %v1851_v5  ;;  %v1471_v57 = vpop.permute.xlu0 %1470 }
 0x2a7   : > { %3001 = vmatprep.mubr.msk.f32.mxu0 %vm2177_vm10, %v2153_v11  ;;  %v2056_v39 = vsel %vm2029_vm6, %v2023_v40, %v1471_v57 }
 0x2a9   : > { %v1345_v54 = vpop.permute.xlu1 %1344 }
 0x2aa   : > { %v965_v15 = vpop.permute.xlu0 %964  ;;  %v2024_v21 = vsel %vm1996_vm5, %v1991_v4, %v1345_v54  ;;  %v4213_v4 = vpop.f32.mrf.mxu0 }
 0x2ab   : > { %v1927_v44 = vsel %vm496_vm0, %v3941_v7, %v965_v15 }
 0x2ad   : > { %v1853_v2 = vpop.permute.xlu1 %1852 }
 0x2ae   : > { %v2154_v43 = vsel %vm2128_vm9, %v2121_v19, %v1853_v2  ;;  %v1473_v1 = vpop.permute.xlu0 %1472 }
 0x2af   : > { %3002 = vmatmul.mubr.msk.f32.gmra.mxu0 %vm2177_vm10, %v2154_v43  ;;  %v2057_v27 = vsel %vm2029_vm6, %v2024_v21, %v1473_v1 }
 0x2b1   : > { %v1091_v45 = vpop.permute.xlu1 %1090 }
 0x2b2   : > { %v1093_v25 = vpop.permute.xlu0 %1092  ;;  %v1959_v38 = vsel %vm1930_vm3, %v1926_v14, %v1091_v45 }
 0x2b3   : > { %v1960_v57 = vsel %vm1930_vm3, %v1927_v44, %v1093_v25 }
 0x2b5   : > { %v1599_v8 = vpop.permute.xlu1 %1598 }
 0x2b6   : > { %v1601_v49 = vpop.permute.xlu0 %1600  ;;  %v2089_v23 = vsel %vm2062_vm7, %v2056_v39, %v1599_v8 }
 0x2b7   : > { %v2090_v41 = vsel %vm2062_vm7, %v2057_v27, %v1601_v49 }
 0x2b9   : > { %v1219_v52 = vpop.permute.xlu1 %1218 }
 0x2ba   : > { %v1221_v10 = vpop.permute.xlu0 %1220  ;;  %v1992_v5 = vsel %vm1963_vm4, %v1959_v38, %v1219_v52 }
 0x2bb   : > { %v1993_v54 = vsel %vm1963_vm4, %v1960_v57, %v1221_v10 }
 0x2bd   : > { %v1727_v51 = vpop.permute.xlu1 %1726 }
 0x2be   : > { %v1729_v18 = vpop.permute.xlu0 %1728  ;;  %v2122_v30 = vsel %vm2095_vm8, %v2089_v23, %v1727_v51 }
 0x2bf   : > { %v2123_v32 = vsel %vm2095_vm8, %v2090_v41, %v1729_v18 }
 0x2c1   : > { %v1347_v20 = vpop.permute.xlu1 %1346 }
 0x2c2   : > { %v967_v37 = vpop.permute.xlu0 %966  ;;  %v2025_v16 = vsel %vm1996_vm5, %v1992_v5, %v1347_v20 }
 0x2c3   : > { %v1928_v49 = vsel %vm496_vm0, %v3993_v47, %v967_v37 }
 0x2c5   : > { %v1855_v24 = vpop.permute.xlu1 %1854 }
 0x2c6   : > { %v2155_v61 = vsel %vm2128_vm9, %v2122_v30, %v1855_v24  ;;  %v1475_v48 = vpop.permute.xlu0 %1474 }
 0x2c7   : > { %3004 = vmatprep.mubr.msk.f32.mxu0 %vm2177_vm10, %v2155_v61  ;;  %v2058_v17 = vsel %vm2029_vm6, %v2025_v16, %v1475_v48 }
 0x2c9   : > { %v1349_v55 = vpop.permute.xlu1 %1348 }
 0x2ca   : > { %v969_v34 = vpop.permute.xlu0 %968  ;;  %v2026_v63 = vsel %vm1996_vm5, %v1993_v54, %v1349_v55  ;;  %v4215_v55 = vpop.f32.mrf.mxu0 }
 0x2cb   : > { %v1929_v36 = vsel %vm496_vm0, %v4003_v46, %v969_v34 }
 0x2cc   : > { %v4217_v21 = vpop.f32.mrf.mxu0 }
 0x2cd   : > { %v1857_v0 = vpop.permute.xlu1 %1856 }
 0x2ce   : > { %v2156_v58 = vsel %vm2128_vm9, %v2123_v32, %v1857_v0  ;;  %v1477_v42 = vpop.permute.xlu0 %1476  ;;  %v4219_v27 = vpop.f32.mrf.mxu0 }
 0x2cf   : > { %3005 = vmatmul.mubr.msk.f32.gmra.mxu0 %vm2177_vm10, %v2156_v58  ;;  %v2059_v19 = vsel %vm2029_vm6, %v2026_v63, %v1477_v42 }
 0x2d0   : > { %v4221_v41 = vpop.f32.mrf.mxu0 }
 0x2d1   : > { %v1095_v60 = vpop.permute.xlu1 %1094 }
 0x2d2   : > { %v1097_v50 = vpop.permute.xlu0 %1096  ;;  %v1961_v52 = vsel %vm1930_vm3, %v1928_v49, %v1095_v60  ;;  %v4223_v34 = vpop.f32.mrf.mxu0  ;;  %v4234_v60 = vld [vmem:[%s4350_s4] sm:$0x1] }
 0x2d3   : > { %v1962_v40 = vsel %vm1930_vm3, %v1929_v36, %v1097_v50  ;;  %2945 = vmatprep.mubr.msk.f32.mxu1 %vm1996_vm5, %v4234_v60 }
 0x2d4   : > { %v4225_v32 = vpop.f32.mrf.mxu0 }
 0x2d5   : > { %v1603_v35 = vpop.permute.xlu1 %1602 }
 0x2d6   : > { %v1605_v12 = vpop.permute.xlu0 %1604  ;;  %v2091_v29 = vsel %vm2062_vm7, %v2058_v17, %v1603_v35  ;;  %v4227_v0 = vpop.f32.mrf.mxu0 }
 0x2d7   : > { %v2092_v15 = vsel %vm2062_vm7, %v2059_v19, %v1605_v12 }
 0x2d8   : > { %v2979_v58 = vpop.f32.mrf.mxu0 }
 0x2d9   : > { %v1223_v56 = vpop.permute.xlu1 %1222 }
 0x2da   : > { %v1225_v31 = vpop.permute.xlu0 %1224  ;;  %v1994_v10 = vsel %vm1963_vm4, %v1961_v52, %v1223_v56  ;;  %v4229_v42 = vpop.f32.mrf.mxu0 }
 0x2db   : > { %v1995_v23 = vsel %vm1963_vm4, %v1962_v40, %v1225_v31 }
 0x2dc   : > { %v2982_v50 = vpop.f32.mrf.mxu0 }
 0x2dd   : > { %v1731_v33 = vpop.permute.xlu1 %1730 }
 0x2de   : > { %v1733_v59 = vpop.permute.xlu0 %1732  ;;  %v2124_v28 = vsel %vm2095_vm8, %v2091_v29, %v1731_v33  ;;  %v2390_v35 = vpop.f32.mrf.mxu0 }
 0x2df   : > { %v2125_v2 = vsel %vm2095_vm8, %v2092_v15, %v1733_v59 }
 0x2e0   : > { %v2985_v12 = vpop.f32.mrf.mxu0 }
 0x2e1   : > { %v1351_v11 = vpop.permute.xlu1 %1350 }
 0x2e2   : > { %v1353_v6 = vpop.permute.xlu0 %1352  ;;  %v2027_v3 = vsel %vm1996_vm5, %v1994_v10, %v1351_v11  ;;  %v2400_v56 = vpop.f32.mrf.mxu0 }
 0x2e3   : > { %v2028_v24 = vsel %vm1996_vm5, %v1995_v23, %v1353_v6 }
 0x2e4   : > { %v2988_v31 = vpop.f32.mrf.mxu0 }
 0x2e5   : > { %v1859_v53 = vpop.permute.xlu1 %1858 }
 0x2e6   : > { %v2157_v7 = vsel %vm2128_vm9, %v2124_v28, %v1859_v53  ;;  %v1861_v43 = vpop.permute.xlu0 %1860  ;;  %v2410_v33 = vpop.f32.mrf.mxu0  ;;  %v4253_v53 = vld [vmem:[%s4349_s3] ss:$0 sm:$0xff] }
 0x2e7   : > { %3007 = vmatprep.mubr.msk.f32.mxu0 %vm2177_vm10, %v2157_v7  ;;  %v2158_v45 = vsel %vm2128_vm9, %v2125_v2, %v1861_v43  ;;  %v2416_v19 = vadd.f32 %v2988_v31, %v4253_v53  ;;  %v2406_v52 = vadd.f32 %v2985_v12, %v4253_v53  ;;  %v2396_v40 = vadd.f32 %v2982_v50, %v4253_v53 }
 0x2e8   : > { %3008 = vmatmul.mubr.msk.f32.gmra.mxu0 %vm2177_vm10, %v2158_v45 }
 0x2e9   : > { %v1479_v1 = vpop.permute.xlu1 %1478  ;;  %v2514_v45 = vmax.f32 %v2416_v19, 0.0 }
 0x2ea   : > { %v1607_v25 = vpop.permute.xlu0 %1606  ;;  %v2060_v18 = vsel %vm2029_vm6, %v2027_v3, %v1479_v1 }
 0x2eb   : > { %v2093_v20 = vsel %vm2062_vm7, %v2060_v18, %v1607_v25  ;;  %v2411_v25 = vadd.f32 %v4253_v53, %v2410_v33  ;;  %v2401_v18 = vadd.f32 %v4253_v53, %v2400_v56 }
 0x2ed   : > { %v1481_v8 = vpop.permute.xlu1 %1480  ;;  %v2513_v10 = vmax.f32 %v2411_v25, 0.0 }
 0x2ee   : > { %v1735_v51 = vpop.permute.xlu0 %1734  ;;  %v2061_v61 = vsel %vm2029_vm6, %v2028_v24, %v1481_v8 }
 0x2ef   : > { %v2126_v39 = vsel %vm2095_vm8, %v2093_v20, %v1735_v51  ;;  %v4238_v14 = vpop.f32.mrf.mxu0 }
 0x2f1   : > { %v1609_v26 = vpop.permute.xlu1 %1608  ;;  %v4240_v38 = vpop.f32.mrf.mxu0 }
 0x2f2   : > { %v1863_v47 = vpop.permute.xlu0 %1862  ;;  %v2094_v46 = vsel %vm2062_vm7, %v2061_v61, %v1609_v26  ;;  %v2512_v26 = vmax.f32 %v2406_v52, 0.0 }
 0x2f3   : > { %v2159_v30 = vsel %vm2128_vm9, %v2126_v39, %v1863_v47  ;;  %v2511_v39 = vmax.f32 %v2401_v18, 0.0 }
 0x2f4   : > { %3010 = vmatprep.mubr.msk.f32.mxu0 %vm2177_vm10, %v2159_v30  ;;  %v2391_v30 = vadd.f32 %v4253_v53, %v2390_v35  ;;  %v2381_v35 = vadd.f32 %v4253_v53, %v4229_v42  ;;  %v2371_v42 = vadd.f32 %v4253_v53, %v4227_v0 }
 0x2f5   : > { %v1737_v37 = vpop.permute.xlu1 %1736 }
 0x2f6   : > { %v2127_v22 = vsel %vm2095_vm8, %v2094_v46, %v1737_v37  ;;  %v2510_v37 = vmax.f32 %v2396_v40, 0.0  ;;  %v2386_v46 = vadd.f32 %v2979_v58, %v4253_v53  ;;  %v2376_v58 = vadd.f32 %v4225_v32, %v4253_v53 }
 0x2f7   : > { %v2507_v31 = vmax.f32 %v2381_v35, 0.0  ;;  %v2366_v32 = vadd.f32 %v4221_v41, %v4253_v53  ;;  %v2356_v41 = vadd.f32 %v4217_v21, %v4253_v53  ;;  %v2346_v21 = vadd.f32 %v4213_v4, %v4253_v53 }
 0x2f8   : > { %v2508_v50 = vmax.f32 %v2386_v46, 0.0 }
 0x2f9   : > { %v1865_v62 = vpop.permute.xlu1 %1864  ;;  %v2504_v0 = vmax.f32 %v2366_v32, 0.0 }
 0x2fa   : > { %v2160_v48 = vsel %vm2128_vm9, %v2127_v22, %v1865_v62  ;;  %v2509_v22 = vmax.f32 %v2391_v30, 0.0 }
 0x2fb   : > { %3011 = vmatmul.mubr.msk.f32.gmra.mxu0 %vm2177_vm10, %v2160_v48 }
 0x30f   : > { %v4242_v59 = vpop.f32.mrf.mxu0 }
 0x311   : > { %v4244_v5 = vpop.f32.mrf.mxu0 }
 0x32f   : > { %v4246_v11 = vpop.f32.mrf.mxu0 }
 0x331   : > { %v4248_v44 = vpop.f32.mrf.mxu0 }
 0x34f   : > { %v3000_v16 = vpop.f32.mrf.mxu0 }
 0x350   : > { %v2456_v12 = vadd.f32 %v3000_v16, %v4253_v53  ;;  %v2446_v16 = vadd.f32 %v4246_v11, %v4253_v53  ;;  %v2361_v11 = vadd.f32 %v4253_v53, %v4223_v34  ;;  %v2502_v34 = vmax.f32 %v2356_v41, 0.0 }
 0x351   : > { %v2450_v57 = vpop.f32.mrf.mxu0 }
 0x352   : > { %v2522_v33 = vmax.f32 %v2456_v12, 0.0 }
 0x36f   : > { %v3003_v17 = vpop.f32.mrf.mxu0 }
 0x370   : > { %v2466_v24 = vadd.f32 %v3003_v17, %v4253_v53  ;;  %v2451_v17 = vadd.f32 %v4253_v53, %v2450_v57  ;;  %v2505_v57 = vmax.f32 %v2371_v42, 0.0 }
 0x371   : > { %v2460_v54 = vpop.f32.mrf.mxu0 }
 0x372   : > { %v2524_v62 = vmax.f32 %v2466_v24, 0.0  ;;  %v2461_v48 = vadd.f32 %v4253_v53, %v2460_v54  ;;  %v2506_v54 = vmax.f32 %v2376_v58, 0.0 }
 0x374   : > { %v2523_v56 = vmax.f32 %v2461_v48, 0.0 }
 0x38f   : > { %v3006_v29 = vpop.f32.mrf.mxu0 }
 0x390   : > { %v2476_v36 = vadd.f32 %v3006_v29, %v4253_v53  ;;  %v2521_v29 = vmax.f32 %v2451_v17, 0.0 }
 0x391   : > { %v2470_v6 = vpop.f32.mrf.mxu0 }
 0x392   : > { %v2526_v47 = vmax.f32 %v2476_v36, 0.0  ;;  %v2471_v23 = vadd.f32 %v4253_v53, %v2470_v6  ;;  %v2520_v6 = vmax.f32 %v2446_v16, 0.0 }
 0x394   : > { %v2525_v61 = vmax.f32 %v2471_v23, 0.0 }
 0x3a8   : > { %v3009_v63 = vpop.f32.mrf.mxu0 }
 0x3a9   : > { %v2486_v8 = vadd.f32 %v3009_v63, %v4253_v53  ;;  %v2441_v63 = vadd.f32 %v4253_v53, %v4248_v44  ;;  %v2503_v44 = vmax.f32 %v2361_v11, 0.0 }
 0x3aa   : > { %v2480_v28 = vpop.f32.mrf.mxu0 }
 0x3ab   : > { %v2528_v51 = vmax.f32 %v2486_v8, 0.0  ;;  %v2481_v3 = vadd.f32 %v4253_v53, %v2480_v28  ;;  %v2436_v28 = vadd.f32 %v4242_v59, %v4253_v53  ;;  %v2519_v19 = vmax.f32 %v2441_v63, 0.0 }
 0x3ac   : > { %v2351_v59 = vadd.f32 %v4253_v53, %v4219_v27  ;;  %v2500_v27 = vmax.f32 %v2346_v21, 0.0 }
 0x3ad   : > { %v2527_v20 = vmax.f32 %v2481_v3, 0.0 }
 0x3bb   : > { %v3012_v7 = vpop.f32.mrf.mxu0 }
 0x3bc   : > { %v2496_v15 = vadd.f32 %v3012_v7, %v4253_v53  ;;  %v2518_v7 = vmax.f32 %v2436_v28, 0.0 }
 0x3bd   : > { %v2490_v2 = vpop.f32.mrf.mxu0 }
 0x3be   : > { %v2530_v43 = vmax.f32 %v2496_v15, 0.0  ;;  %v2491_v1 = vadd.f32 %v4253_v53, %v2490_v2  ;;  %v2431_v15 = vadd.f32 %v4253_v53, %v4244_v5  ;;  %v2426_v2 = vadd.f32 %v4238_v14, %v4253_v53 }
 0x3bf   : > { %v2501_v5 = vmax.f32 %v2351_v59, 0.0  ;;  %v2341_v14 = vadd.f32 %v4253_v53, %v4215_v55 }
 0x3c0   : > { %v2529_v49 = vmax.f32 %v2491_v1, 0.0  ;;  %2913 = vmatprep.subr.msk.mxu1 %vm1996_vm5, %v2530_v43  ;;  %v2517_v43 = vmax.f32 %v2431_v15, 0.0  ;;  %v2516_v1 = vmax.f32 %v2426_v2, 0.0 }
 0x3c1   : > { %2914 = vmatpush3.xpose.msk.msra.mxu1 %vm1996_vm5, %v2514_v45  ;;  %v2421_v45 = vadd.f32 %v4253_v53, %v4240_v38  ;;  %v2499_v4 = vmax.f32 %v2341_v14, 0.0  ;;  %v2533_v38 = vstv %s2532_s13 }
 0x3c2   : > { %2915 = vmatprep.subr.msk.mxu1 %vm1996_vm5, %v2529_v49 }
 0x3c3   : > { %v2515_v25 = vmax.f32 %v2421_v45, 0.0 }
 0x3c5   : > { %2916 = vmatpush3.xpose.msk.msra.mxu1 %vm1996_vm5, %v2513_v10 }
 0x3c6   : > { %2917 = vmatprep.subr.msk.mxu1 %vm1996_vm5, %v2528_v51 }
 0x3c9   : > { %2918 = vmatpush3.xpose.msk.msra.mxu1 %vm1996_vm5, %v2512_v26 }
 0x3ca   : > { %2919 = vmatprep.subr.msk.mxu1 %vm1996_vm5, %v2527_v20 }
 0x3cd   : > { %2920 = vmatpush3.xpose.msk.msra.mxu1 %vm1996_vm5, %v2511_v39 }
 0x3ce   : > { %2921 = vmatprep.subr.msk.mxu1 %vm1996_vm5, %v2526_v47 }
 0x3d1   : > { %2922 = vmatpush3.xpose.msk.msra.mxu1 %vm1996_vm5, %v2510_v37 }
 0x3d2   : > { %2923 = vmatprep.subr.msk.mxu1 %vm1996_vm5, %v2525_v61 }
 0x3d5   : > { %2924 = vmatpush3.xpose.msk.msra.mxu1 %vm1996_vm5, %v2509_v22 }
 0x3d6   : > { %2925 = vmatprep.subr.msk.mxu1 %vm1996_vm5, %v2524_v62 }
 0x3d9   : > { %2926 = vmatpush3.xpose.msk.msra.mxu1 %vm1996_vm5, %v2508_v50 }
 0x3da   : > { %2927 = vmatprep.subr.msk.mxu1 %vm1996_vm5, %v2523_v56 }
 0x3dd   : > { %2928 = vmatpush3.xpose.msk.msra.mxu1 %vm1996_vm5, %v2507_v31 }
 0x3de   : > { %2929 = vmatprep.subr.msk.mxu1 %vm1996_vm5, %v2522_v33 }
 0x3e1   : > { %2930 = vmatpush3.xpose.msk.msra.mxu1 %vm1996_vm5, %v2506_v54 }
 0x3e2   : > { %2931 = vmatprep.subr.msk.mxu1 %vm1996_vm5, %v2521_v29 }
 0x3e5   : > { %2932 = vmatpush3.xpose.msk.msra.mxu1 %vm1996_vm5, %v2505_v57 }
 0x3e6   : > { %2933 = vmatprep.subr.msk.mxu1 %vm1996_vm5, %v2520_v6 }
 0x3e9   : > { %2934 = vmatpush3.xpose.msk.msra.mxu1 %vm1996_vm5, %v2504_v0 }
 0x3ea   : > { %2935 = vmatprep.subr.msk.mxu1 %vm1996_vm5, %v2519_v19 }
 0x3ed   : > { %2936 = vmatpush3.xpose.msk.msra.mxu1 %vm1996_vm5, %v2503_v44 }
 0x3ee   : > { %2937 = vmatprep.subr.msk.mxu1 %vm1996_vm5, %v2518_v7 }
 0x3f1   : > { %2938 = vmatpush3.xpose.msk.msra.mxu1 %vm1996_vm5, %v2502_v34 }
 0x3f2   : > { %2939 = vmatprep.subr.msk.mxu1 %vm1996_vm5, %v2517_v43 }
 0x3f5   : > { %2940 = vmatpush3.xpose.msk.msra.mxu1 %vm1996_vm5, %v2501_v5 }
 0x3f6   : > { %2941 = vmatprep.subr.msk.mxu1 %vm1996_vm5, %v2516_v1 }
 0x3f9   : > { %2942 = vmatpush3.xpose.msk.msra.mxu1 %vm1996_vm5, %v2500_v27 }
 0x3fa   : > { %2943 = vmatprep.subr.msk.mxu1 %vm1996_vm5, %v2515_v25 }
 0x3fd   : > { %2944 = vmatpush3.xpose.msk.msra.mxu1 %vm1996_vm5, %v2499_v4 }
 0x400   : > { %2946 = vmatmul.mubr.msk.f32.vlgmr.msra.gmra.mxu1 %vm1996_vm5, %v4234_v60 }
 0x4c0   : > { %v2699_v8 = vpop.f32.mrf.mxu1 }
 0x4c1   : > { %v2700_v52 = vadd.f32 %v2699_v8, %v2533_v38 }
 0x4c2   : > { %v2701_v49 = vpop.f32.mrf.mxu1 }
 0x4c3   : > { %v2702_v10 = vadd.f32 %v2701_v49, %v2533_v38 }
 0x4c5   : > { %v2706_v51 = vcombine.low %v2700_v52, %v2702_v10 }
 0x4c7   : > { %v2713_v55 = vrot.slane %v2706_v51, %v3177_v13 }
 0x4c9   : > { %v2720_v53 = vrot.slane %v2713_v55, %v3177_v13 }
 0x4cb   : > { %2726 = vst.msk [vmem:[%s270_s20] sm:$0x3] %vm2724_vm11, %v2720_v53 }
 0x4cc PF: > { %s17_s23 = sadd.s32 1, %s3040_s23  }
 0x4cd   : > { %p14_p4 = scmp.ge.s32.totalorder %s17_s23, 4  }
 0x4cf   :  { %16 = sbr.rel (!%p14_p4) target bundleno = 2 (0x2), region = 79 }

</bundles_post_ra>
